<compile_context>
chip_gen: v7x
topology: tpu7x:2x2x1
jax: 0.10.0
libtpu: 0.0.40
codegen_flags: <defaults>
</compile_context>

<pallas_src>
import functools

import jax
import jax.numpy as jnp
import numpy as np
from jax.experimental import pallas as pl
from jax.experimental.pallas import tpu as pltpu


HID1 = 256
HID2 = 512


def _round_up(x, m):
    return (x + m - 1) // m * m


def _vmem_capacity_bytes():
    try:
        return int(pltpu.get_tpu_info().vmem_capacity_bytes)
    except Exception:
        return 64 * 1024 * 1024  # conservative (v7x-sized) fallback


def _pick_tiles(batch, image_dim, vmem_cap):
    """Pick (tile_b, b_pad, tile_n, n_pad) for the current chip."""
    # v7x: 64 MiB VMEM per TC and 2 TCs per chip; v5e/v6e: 128 MiB, 1 TC.
    two_cores = vmem_cap < 96 * 1024 * 1024

    b8 = _round_up(max(batch, 1), 8)
    if two_cores:
        if b8 >= 512:
            tile_b = 256          # >=2 tiles and ~1024 flop/B per TC
        else:
            # guarantee >=2 batch tiles so both TensorCores get work
            tile_b = min(128, _round_up(max(b8 // 2, 8), 8))
    else:
        # single TC: bigger batch tile lifts layer-3 arithmetic intensity
        tile_b = min(b8, 256)
    b_pad = _round_up(b8, tile_b)

    # N tiling: cap by VMEM, then split n evenly so nothing is truncated.
    n128 = _round_up(image_dim, 128)
    n_cap = 8192 if vmem_cap >= 100 * 1024 * 1024 else 4096
    n_tiles = -(-n128 // n_cap)                       # ceil div
    tile_n = _round_up(-(-n128 // n_tiles), 128)
    n_pad = tile_n * n_tiles                          # exact multiple of tile_n
    return tile_b, b_pad, tile_n, n_pad


def generator_kernel(x_ref, w1_ref, b1_ref, w2_ref, b2_ref, w3_ref, b3_ref,
                     o_ref, h2_scratch):
    n_idx = pl.program_id(1)

    # Layers 1 and 2 depend only on the batch tile -> compute once per batch
    # tile (first N step) and cache h2 in VMEM scratch for the remaining N
    # tiles of layer 3.  Valid ONLY while the N axis is the innermost,
    # sequentially iterated ("arbitrary") grid axis.
    @pl.when(n_idx == 0)
    def _():
        x = x_ref[...].astype(jnp.bfloat16)           # fused concat done in wrapper
        h1 = jnp.dot(x, w1_ref[...],
                     preferred_element_type=jnp.float32) + b1_ref[...]
        h1 = jnp.maximum(h1, 0.0)                     # ReLU in f32 (v5e-safe)
        h2 = jnp.dot(h1.astype(jnp.bfloat16), w2_ref[...],
                     preferred_element_type=jnp.float32) + b2_ref[...]
        h2_scratch[...] = jnp.maximum(h2, 0.0).astype(jnp.bfloat16)

    # Layer 3 for this (batch tile, N tile): bf16 MXU operands, f32 accumulate,
    # Tanh in f32, lane-dense (128-multiple) store.
    h3 = jnp.dot(h2_scratch[...], w3_ref[...],
                 preferred_element_type=jnp.float32) + b3_ref[...]
    o_ref[...] = jnp.tanh(h3).astype(o_ref.dtype)


@functools.partial(jax.jit, static_argnames=("image_dim", "out_dtype"))
def generator_forward(noise, labels, params, image_dim, out_dtype=jnp.float32):
    """noise: [B, noise_dim], labels: [B, label_dim] -> [B, image_dim]."""
    w1, b1, w2, b2, w3p, b3p = params
    k_pad = w1.shape[0]                       # (noise_dim + label_dim) padded to 8

    B = noise.shape[0]
    vmem_cap = _vmem_capacity_bytes()
    tile_b, b_pad, tile_n, n_pad = _pick_tiles(B, image_dim, vmem_cap)

    # Fused concat + K/B padding done once on a tiny array (B x k_pad f32).
    x = jnp.concatenate(
        [noise.astype(jnp.float32), labels.astype(jnp.float32)], axis=1)
    x = jnp.pad(x, ((0, b_pad - B), (0, k_pad - x.shape[1])))

    # Extend the 128-padded W3/b3 to the tile_n-aligned width if needed.
    if n_pad != w3p.shape[1]:
        w3p = jnp.pad(w3p, ((0, 0), (0, n_pad - w3p.shape[1])))
        b3p = jnp.pad(b3p, ((0, 0), (0, n_pad - b3p.shape[1])))

    grid = (b_pad // tile_b, n_pad // tile_n)     # both divide exactly

    const = lambda b, n: (0, 0)                   # weights resident across the grid
    in_specs = [
        pl.BlockSpec((tile_b, k_pad), lambda b, n: (b, 0)),
        pl.BlockSpec((k_pad, HID1), const),
        pl.BlockSpec((1, HID1), const),
        pl.BlockSpec((HID1, HID2), const),
        pl.BlockSpec((1, HID2), const),
        pl.BlockSpec((HID2, tile_n), lambda b, n: (0, n)),
        pl.BlockSpec((1, tile_n), lambda b, n: (0, n)),
    ]
    out_specs = pl.BlockSpec((tile_b, tile_n), lambda b, n: (b, n))

    out_itemsize = jnp.dtype(out_dtype).itemsize
    n_batch_tiles = b_pad // tile_b
    resident_bytes = (k_pad * HID1 + HID1 * HID2) * 2 + (HID1 + HID2) * 4
    cost = pl.CostEstimate(
        flops=2 * b_pad * (k_pad * HID1 + HID1 * HID2 + HID2 * n_pad),
        transcendentals=b_pad * n_pad,
        bytes_accessed=int(
            x.size * 4                                        # activations in
            + resident_bytes                                  # W1/b1/W2/b2
            + n_batch_tiles * (HID2 * n_pad * 2 + n_pad * 4)  # W3/b3 re-streamed
            + b_pad * n_pad * out_itemsize),                  # padded output write
    )

    out = pl.pallas_call(
        generator_kernel,
        out_shape=jax.ShapeDtypeStruct((b_pad, n_pad), out_dtype),
        grid=grid,
        in_specs=in_specs,
        out_specs=out_specs,
        scratch_shapes=[pltpu.VMEM((tile_b, HID2), jnp.bfloat16)],
        compiler_params=pltpu.CompilerParams(
            # Batch axis parallel (megacore); N axis MUST stay "arbitrary"
            # and innermost for the h2_scratch caching to be valid.
            dimension_semantics=("parallel", "arbitrary"),
            vmem_limit_bytes=int(vmem_cap * 3 // 4),
        ),
        cost_estimate=cost,
    )(x, w1, b1, w2, b2, w3p, b3p)

    # Strip batch/lane padding (padded output columns are tanh(bias-only)).
    return out[:B, :image_dim]


def init_params(key, noise_dim, label_dim, image_dim):
    """PyTorch nn.Linear-style init (uniform +/- 1/sqrt(fan_in)).

    Weights stored [in, out] in bf16 (MXU operands), biases [1, out] in f32.
    W1's input dim is zero-padded to a multiple of 8 (matches the K-padded
    concatenated input); W3/b3 are zero-padded along the output dim to a
    multiple of 128 for lane-dense stores.
    """
    in_dim = noise_dim + label_dim
    k_pad = _round_up(in_dim, 8)
    n_pad = _round_up(image_dim, 128)

    def linear(key, fan_in, fan_out):
        kw, kb = jax.random.split(key)
        bound = 1.0 / np.sqrt(fan_in)
        w = jax.random.uniform(kw, (fan_in, fan_out), jnp.float32, -bound, bound)
        b = jax.random.uniform(kb, (1, fan_out), jnp.float32, -bound, bound)
        return w, b

    k1, k2, k3 = jax.random.split(key, 3)
    w1, b1 = linear(k1, in_dim, HID1)
    w2, b2 = linear(k2, HID1, HID2)
    w3, b3 = linear(k3, HID2, image_dim)

    w1p = jnp.zeros((k_pad, HID1), jnp.bfloat16).at[:in_dim].set(
        w1.astype(jnp.bfloat16))
    w3p = jnp.zeros((HID2, n_pad), jnp.bfloat16).at[:, :image_dim].set(
        w3.astype(jnp.bfloat16))
    b3p = jnp.zeros((1, n_pad), jnp.float32).at[:, :image_dim].set(b3)
    return (w1p, b1, w2.astype(jnp.bfloat16), b2, w3p, b3p)


def reference_forward(noise, labels, params, image_dim):
    """Pure-JAX reference with identical bf16-operand / f32-accumulate math."""
    w1, b1, w2, b2, w3p, b3p = params
    hi = jax.lax.Precision.HIGHEST
    f32 = jnp.float32
    in_dim = noise.shape[1] + labels.shape[1]
    x = jnp.concatenate([noise, labels], axis=1).astype(jnp.bfloat16).astype(f32)
    h1 = jnp.dot(x, w1[:in_dim].astype(f32), precision=hi) + b1
    h1 = jnp.maximum(h1, 0.0)
    h2 = jnp.dot(h1.astype(jnp.bfloat16).astype(f32), w2.astype(f32),
                 precision=hi) + b2
    h2 = jnp.maximum(h2, 0.0)
    h3 = jnp.dot(h2.astype(jnp.bfloat16).astype(f32), w3p.astype(f32),
                 precision=hi) + b3p
    return jnp.tanh(h3)[:, :image_dim]


if __name__ == "__main__":
    noise_dim, label_dim, image_dim = 16, 10, 64
    batch = 256  # exercises the parallel batch grid (2 tiles on a 2-TC chip)

    key = jax.random.PRNGKey(0)
    key, kn, kl = jax.random.split(key, 3)
    noise = jax.random.normal(kn, (batch, noise_dim), jnp.float32)
    # one-hot labels, like conditional-GAN label inputs
    labels = jax.nn.one_hot(
        jax.random.randint(kl, (batch,), 0, label_dim), label_dim
    ).astype(jnp.float32)

    params = init_params(key, noise_dim, label_dim, image_dim)

    out = generator_forward(noise, labels, params, image_dim)
    out = jax.block_until_ready(out)
    assert out.shape == (batch, image_dim)

    ref = reference_forward(noise, labels, params, image_dim)
    np.testing.assert_allclose(np.asarray(out), np.asarray(ref),
                               rtol=2e-3, atol=2e-3)

    print("KERNEL_OK")
</pallas_src>

<mosaic_0001>
module attributes {stable_mosaic.version = 11 : i64} {
  func.func @generator_kernel(%arg0: i32, %arg1: i32, %arg2: memref<128x32xf32, #tpu.memory_space<vmem>>, %arg3: memref<32x256xbf16, #tpu.memory_space<vmem>>, %arg4: memref<1x256xf32, #tpu.memory_space<vmem>>, %arg5: memref<256x512xbf16, #tpu.memory_space<vmem>>, %arg6: memref<1x512xf32, #tpu.memory_space<vmem>>, %arg7: memref<512x128xbf16, #tpu.memory_space<vmem>>, %arg8: memref<1x128xf32, #tpu.memory_space<vmem>>, %arg9: memref<128x128xf32, #tpu.memory_space<vmem>>, %arg10: memref<128x512xbf16, #tpu.memory_space<vmem>>) attributes {dimension_semantics = [#tpu.dimension_semantics<parallel>, #tpu.dimension_semantics<arbitrary>], iteration_bounds = array<i64: 2, 1>, scalar_prefetch = 0 : i64, scratch_operands = 1 : i64, tpu.core_type = #tpu.core_type<tc>, window_params = [{transform_indices = @transform_0, window_bounds = array<i64: 128, 32>}, {pipeline_mode = #tpu.pipeline_mode<synchronous>, transform_indices = @transform_1, window_bounds = array<i64: 32, 256>}, {pipeline_mode = #tpu.pipeline_mode<synchronous>, transform_indices = @transform_2, window_bounds = array<i64: 1, 256>}, {pipeline_mode = #tpu.pipeline_mode<synchronous>, transform_indices = @transform_3, window_bounds = array<i64: 256, 512>}, {pipeline_mode = #tpu.pipeline_mode<synchronous>, transform_indices = @transform_4, window_bounds = array<i64: 1, 512>}, {transform_indices = @transform_5, window_bounds = array<i64: 512, 128>}, {transform_indices = @transform_6, window_bounds = array<i64: 1, 128>}, {transform_indices = @transform_7, window_bounds = array<i64: 128, 128>}]} {
    %c0_i32 = arith.constant 0 : i32
    %0 = arith.cmpi eq, %arg1, %c0_i32 : i32
    %1 = arith.extui %0 : i1 to i32
    %c0_i32_0 = arith.constant 0 : i32
    %2 = arith.cmpi ne, %1, %c0_i32_0 : i32
    scf.if %2 {
      %c0_8 = arith.constant 0 : index
      %c0_9 = arith.constant 0 : index
      %11 = vector.load %arg2[%c0_8, %c0_9] : memref<128x32xf32, #tpu.memory_space<vmem>>, vector<128x32xf32>
      %12 = arith.truncf %11 : vector<128x32xf32> to vector<128x32xbf16>
      %c0_10 = arith.constant 0 : index
      %c0_11 = arith.constant 0 : index
      %13 = vector.load %arg3[%c0_10, %c0_11] : memref<32x256xbf16, #tpu.memory_space<vmem>>, vector<32x256xbf16>
      %cst_12 = arith.constant dense<0.000000e+00> : vector<128x256xf32>
      %14 = tpu.matmul %12, %13, %cst_12 {dimension_numbers = #tpu.dot_dimension_numbers<[1], [0], [0], [1], [0, 0, 1, 1], [], []>} : vector<128x32xbf16>, vector<32x256xbf16>, vector<128x256xf32> -> vector<128x256xf32>
      %c0_13 = arith.constant 0 : index
      %c0_14 = arith.constant 0 : index
      %15 = vector.load %arg4[%c0_13, %c0_14] : memref<1x256xf32, #tpu.memory_space<vmem>>, vector<1x256xf32>
      %16 = vector.broadcast %15 : vector<1x256xf32> to vector<128x256xf32>
      %17 = arith.addf %14, %16 : vector<128x256xf32>
      %cst_15 = arith.constant 0.000000e+00 : f32
      %18 = vector.broadcast %cst_15 : f32 to vector<128x256xf32>
      %19 = arith.maximumf %17, %18 : vector<128x256xf32>
      %20 = arith.truncf %19 : vector<128x256xf32> to vector<128x256xbf16>
      %c0_16 = arith.constant 0 : index
      %c0_17 = arith.constant 0 : index
      %21 = vector.load %arg5[%c0_16, %c0_17] : memref<256x512xbf16, #tpu.memory_space<vmem>>, vector<256x512xbf16>
      %cst_18 = arith.constant dense<0.000000e+00> : vector<128x512xf32>
      %22 = tpu.matmul %20, %21, %cst_18 {dimension_numbers = #tpu.dot_dimension_numbers<[1], [0], [0], [1], [0, 0, 1, 1], [], []>} : vector<128x256xbf16>, vector<256x512xbf16>, vector<128x512xf32> -> vector<128x512xf32>
      %c0_19 = arith.constant 0 : index
      %c0_20 = arith.constant 0 : index
      %23 = vector.load %arg6[%c0_19, %c0_20] : memref<1x512xf32, #tpu.memory_space<vmem>>, vector<1x512xf32>
      %24 = vector.broadcast %23 : vector<1x512xf32> to vector<128x512xf32>
      %25 = arith.addf %22, %24 : vector<128x512xf32>
      %cst_21 = arith.constant 0.000000e+00 : f32
      %26 = vector.broadcast %cst_21 : f32 to vector<128x512xf32>
      %27 = arith.maximumf %25, %26 : vector<128x512xf32>
      %28 = arith.truncf %27 : vector<128x512xf32> to vector<128x512xbf16>
      %c0_22 = arith.constant 0 : index
      %c0_23 = arith.constant 0 : index
      %29 = vector.load %arg10[%c0_22, %c0_23] : memref<128x512xbf16, #tpu.memory_space<vmem>>, vector<128x512xbf16>
      tpu.vector_store %arg10[%c0_22, %c0_23], %28 {strides = array<i32>} : memref<128x512xbf16, #tpu.memory_space<vmem>>, vector<128x512xbf16>,
    } else {
    }
    %c0 = arith.constant 0 : index
    %c0_1 = arith.constant 0 : index
    %3 = vector.load %arg10[%c0, %c0_1] : memref<128x512xbf16, #tpu.memory_space<vmem>>, vector<128x512xbf16>
    %c0_2 = arith.constant 0 : index
    %c0_3 = arith.constant 0 : index
    %4 = vector.load %arg7[%c0_2, %c0_3] : memref<512x128xbf16, #tpu.memory_space<vmem>>, vector<512x128xbf16>
    %cst = arith.constant dense<0.000000e+00> : vector<128x128xf32>
    %5 = tpu.matmul %3, %4, %cst {dimension_numbers = #tpu.dot_dimension_numbers<[1], [0], [0], [1], [0, 0, 1, 1], [], []>} : vector<128x512xbf16>, vector<512x128xbf16>, vector<128x128xf32> -> vector<128x128xf32>
    %c0_4 = arith.constant 0 : index
    %c0_5 = arith.constant 0 : index
    %6 = vector.load %arg8[%c0_4, %c0_5] : memref<1x128xf32, #tpu.memory_space<vmem>>, vector<1x128xf32>
    %7 = vector.broadcast %6 : vector<1x128xf32> to vector<128x128xf32>
    %8 = arith.addf %5, %7 : vector<128x128xf32>
    %9 = math.tanh %8 : vector<128x128xf32>
    %c0_6 = arith.constant 0 : index
    %c0_7 = arith.constant 0 : index
    %10 = vector.load %arg9[%c0_6, %c0_7] : memref<128x128xf32, #tpu.memory_space<vmem>>, vector<128x128xf32>
    tpu.vector_store %arg9[%c0_6, %c0_7], %9 {strides = array<i32>} : memref<128x128xf32, #tpu.memory_space<vmem>>, vector<128x128xf32>,
    return
  }
  func.func @transform_0(%arg0: i32, %arg1: i32) -> (i32, i32) {
    %c0_i32 = arith.constant 0 : i32
    %c0_i32_0 = arith.constant 0 : i32
    return %arg0, %c0_i32 : i32, i32
  }
  func.func @transform_1(%arg0: i32, %arg1: i32) -> (i32, i32) {
    %c0_i32 = arith.constant 0 : i32
    %c0_i32_0 = arith.constant 0 : i32
    %c0_i32_1 = arith.constant 0 : i32
    return %c0_i32, %c0_i32_0 : i32, i32
  }
  func.func @transform_2(%arg0: i32, %arg1: i32) -> (i32, i32) {
    %c0_i32 = arith.constant 0 : i32
    %c0_i32_0 = arith.constant 0 : i32
    %c0_i32_1 = arith.constant 0 : i32
    return %c0_i32, %c0_i32_0 : i32, i32
  }
  func.func @transform_3(%arg0: i32, %arg1: i32) -> (i32, i32) {
    %c0_i32 = arith.constant 0 : i32
    %c0_i32_0 = arith.constant 0 : i32
    %c0_i32_1 = arith.constant 0 : i32
    return %c0_i32, %c0_i32_0 : i32, i32
  }
  func.func @transform_4(%arg0: i32, %arg1: i32) -> (i32, i32) {
    %c0_i32 = arith.constant 0 : i32
    %c0_i32_0 = arith.constant 0 : i32
    %c0_i32_1 = arith.constant 0 : i32
    return %c0_i32, %c0_i32_0 : i32, i32
  }
  func.func @transform_5(%arg0: i32, %arg1: i32) -> (i32, i32) {
    %c0_i32 = arith.constant 0 : i32
    %c0_i32_0 = arith.constant 0 : i32
    return %c0_i32, %arg1 : i32, i32
  }
  func.func @transform_6(%arg0: i32, %arg1: i32) -> (i32, i32) {
    %c0_i32 = arith.constant 0 : i32
    %c0_i32_0 = arith.constant 0 : i32
    return %c0_i32, %arg1 : i32, i32
  }
  func.func @transform_7(%arg0: i32, %arg1: i32) -> (i32, i32) {
    %c0_i32 = arith.constant 0 : i32
    return %arg0, %arg1 : i32, i32
  }
}

</mosaic_0001>

<bundles_post_ra>
// kernel: generator_forward.1
= control target key start
LH: loop header
LB: loop body
LE: loop exit
PB: predicated region body
PF: predicated region fallthrough
CT: control target
= control target key end

     0   :  { %s2473_s24 = smov 0   ;;  %s2475_s25 = smov 0   ;;  %s3014_s0 = inlined_call_operand.vmem [shape: f32[256,32], index: 0, kind: input, shape index: {}]   ;;  %s3015_s1 = inlined_call_operand.vmem [shape: bf16[32,256], index: 1, kind: input, shape index: {}]   ;;  %s3016_s2 = inlined_call_operand.vmem [shape: f32[1,256], index: 2, kind: input, shape index: {}]   ;;  %s3017_s3 = inlined_call_operand.vmem [shape: bf16[256,512], index: 3, kind: input, shape index: {}]   ;;  %s3018_s4 = inlined_call_operand.vmem [shape: f32[1,512], index: 4, kind: input, shape index: {}]   ;;  %s3019_s5 = inlined_call_operand.vmem [shape: bf16[512,128], index: 5, kind: input, shape index: {}]   ;;  %s3020_s6 = inlined_call_operand.vmem [shape: f32[1,128], index: 6, kind: input, shape index: {}]   ;;  %s3021_s7 = inlined_call_operand.vmem [shape: f32[256,128], index: 7, kind: output, shape index: {}]  }
   0x1   :  { %s2477_s26 = smov 0  }
   0x2 LB: > { %s29_s27 = sadd.s32 1, %s2426_s25  ;;  %p1973_p0 = scmp.ge.s32.totalorder %s2430_s26, 1  ;;  %s2430_s26 = sphi %s2477_s26, %s17_s26   ;;  %s2426_s25 = sphi %s2475_s25, %s3023_s25   ;;  %s2422_s24 = sphi %s2473_s24, %s3022_s24  }
   0x3   : > { %p31_p1 = scmp.ge.s32.totalorder %s29_s27, 2  ;;  %p269_p2 = scmp.lt.s32.totalorder %s2430_s26, 3 }
   0x5   : > { %s3025_s27 = smov (%p31_p1, %s29_s27), 0  ;;  %p270_p3 = pnand %p1973_p0, %p269_p2 }
   0x6   : > { %v2242_v0 = vld [vmem:[%s3015_s1 + $0x4] ss:$8 sps:$4 sm:$0xff] (!%p270_p3)   ;;  %s1974_s30 = sshll.u32 (!%p270_p3), %s2422_s24, 4  ;;  %v2244_v1 = vld [vmem:[%s3015_s1] ss:$8 sps:$4 sm:$0xff] (!%p270_p3)   ;;  %v2432_v2 = vmov (!%p270_p3), 0  }
   0x7   : > { %273 = sbr.rel (%p270_p3) target bundleno = 753 (0x2f1), region = 48  ;;  %455 = vmatprep.mubr.bf16.mxu0 (!%p270_p3), %v2432_v2  ;;  %p312_p4 = scmp.lt.s32.totalorder (!%p270_p3), %s1974_s30, 31  ;;  %423 = vmatprep.subr.bf16.mxu0 (!%p270_p3), %v2242_v0  ;;  %v2245_v3 = vld [vmem:[%s3015_s1 + $0x14] ss:$8 sps:$4 sm:$0xff] (!%p270_p3)   ;;  %v2247_v4 = vld [vmem:[%s3015_s1 + $0x10] ss:$8 sps:$4 sm:$0xff] (!%p270_p3)  }
   0x8   : > { %424 = vmatpush1.bf16.msra.mxu0 (!%p270_p3), %v2244_v1  ;;  %v2248_v5 = vld [vmem:[%s3017_s3 + $0x4] ss:$16 sps:$4 sm:$0xff] (!%p270_p3)   ;;  %v2252_v6 = vld [vmem:[%s3017_s3 + $0xc] ss:$16 sps:$4 sm:$0xff] (!%p270_p3)   ;;  %v2253_v7 = vld [vmem:[%s3017_s3] ss:$16 sps:$4 sm:$0xff] (!%p270_p3)  }
   0x9   : > { %425 = vmatprep.subr.bf16.mxu0 (!%p270_p3), %v2245_v3  ;;  %990 = vmatprep.subr.bf16.mxu1 (!%p270_p3), %v2248_v5  ;;  %v2254_v8 = vld [vmem:[%s3017_s3 + $0x24] ss:$16 sps:$4 sm:$0xff] (!%p270_p3)   ;;  %vm398_vm0 = vcmask (!%p270_p3), 261120   ;;  %v2250_v11 = vld [vmem:[%s3017_s3 + $0x8] ss:$16 sps:$4 sm:$0xff] (!%p270_p3)  }
   0xa   : > { %991 = vmatpush1.bf16.msra.mxu1 (!%p270_p3), %v2253_v7  ;;  %v2256_v15 = vld [vmem:[%s3017_s3 + $0x28] ss:$16 sps:$4 sm:$0xff] (!%p270_p3)   ;;  %v2258_v16 = vld [vmem:[%s3017_s3 + $0x2c] ss:$16 sps:$4 sm:$0xff] (!%p270_p3)   ;;  %v2259_v17 = vld [vmem:[%s3017_s3 + $0x20] ss:$16 sps:$4 sm:$0xff] (!%p270_p3)  }
   0xb   : > { %992 = vmatprep.subr.bf16.mxu1 (!%p270_p3), %v2254_v8  ;;  %v2260_v19 = vld [vmem:[%s3017_s3 + $0x44] ss:$16 sps:$4 sm:$0xff] (!%p270_p3)   ;;  %v2262_v20 = vld [vmem:[%s3017_s3 + $0x48] ss:$16 sps:$4 sm:$0xff] (!%p270_p3)   ;;  %v2264_v21 = vld [vmem:[%s3017_s3 + $0x4c] ss:$16 sps:$4 sm:$0xff] (!%p270_p3)  }
   0xc   : > { %426 = vmatpush1.bf16.msra.mxu0 (!%p270_p3), %v2247_v4  ;;  %v2265_v22 = vld [vmem:[%s3017_s3 + $0x40] ss:$16 sps:$4 sm:$0xff] (!%p270_p3)   ;;  %v2266_v23 = vld [vmem:[%s3017_s3 + $0x64] ss:$16 sps:$4 sm:$0xff] (!%p270_p3)   ;;  %v2270_v26 = vld [vmem:[%s3017_s3 + $0x6c] ss:$16 sps:$4 sm:$0xff] (!%p270_p3)  }
   0xd   : > { %1103 = vmatprep.subr.bf16.mxu0 (!%p270_p3), %v2252_v6  ;;  %v2271_v27 = vld [vmem:[%s3017_s3 + $0x60] ss:$16 sps:$4 sm:$0xff] (!%p270_p3)   ;;  %v2268_v28 = vld [vmem:[%s3017_s3 + $0x68] ss:$16 sps:$4 sm:$0xff] (!%p270_p3)   ;;  %v2272_v29 = vld [vmem:[%s3017_s3 + $0x84] ss:$16 sps:$4 sm:$0xff] (!%p270_p3)  }
   0xe   : > { %s3027_s30 = smov (!%p312_p4, %s1974_s30), 31  ;;  %993 = vmatpush1.bf16.msra.mxu1 %v2259_v17  ;;  %v2276_v30 = vld [vmem:[%s3017_s3 + $0x8c] ss:$16 sps:$4 sm:$0xff]   ;;  %v2274_v32 = vld [vmem:[%s3017_s3 + $0x88] ss:$16 sps:$4 sm:$0xff]  }
   0xf   : > { %s1975_s18 = sshll.u32 %s3027_s30, 3  ;;  %994 = vmatprep.subr.bf16.mxu1 %v2260_v19  ;;  %v2277_v33 = vld [vmem:[%s3017_s3 + $0x80] ss:$16 sps:$4 sm:$0xff]   ;;  %v2278_v34 = vld [vmem:[%s3017_s3 + $0xa4] ss:$16 sps:$4 sm:$0xff]  }
  0x10   : > { %s2521_s23 = scalar_lea.vmem %s3014_s0, %s1975_s18  ;;  %v2282_v35 = vld [vmem:[%s3017_s3 + $0xac] ss:$16 sps:$4 sm:$0xff]   ;;  %v2283_v38 = vld [vmem:[%s3017_s3 + $0xa0] ss:$16 sps:$4 sm:$0xff]   ;;  %v2280_v39 = vld [vmem:[%s3017_s3 + $0xa8] ss:$16 sps:$4 sm:$0xff]   ;;  %s2975_s29 = scalar_lea.vmem %s3021_s7, %s1975_s18 }
  0x11   : > { %v338_v9 = vld [vmem:[%s2521_s23] sm:$0xff]  ;;  %v339_v10 = vld [vmem:[%s2521_s23 + $0x8] sm:$0xff]  ;;  %v340_v13 = vld [vmem:[%s2521_s23 + $0x10] sm:$0xff] }
  0x12   : > { %v354_v12 = vpack.c.bf16 %v339_v10, %v338_v9  ;;  %v341_v14 = vld [vmem:[%s2521_s23 + $0x18] sm:$0xff]  ;;  %v342_v24 = vld [vmem:[%s2521_s23 + $0x20] sm:$0xff]  ;;  %v343_v25 = vld [vmem:[%s2521_s23 + $0x28] sm:$0xff]  ;;  %995 = vmatpush1.bf16.msra.mxu1 %v2265_v22 }
  0x13   : > { %v355_v18 = vpack.c.bf16 %v341_v14, %v340_v13  ;;  %996 = vmatprep.subr.bf16.mxu1 %v2266_v23  ;;  %v356_v31 = vpack.c.bf16 %v343_v25, %v342_v24  ;;  %v344_v36 = vld [vmem:[%s2521_s23 + $0x30] sm:$0xff]  ;;  %v345_v37 = vld [vmem:[%s2521_s23 + $0x38] sm:$0xff]  ;;  %v346_v47 = vld [vmem:[%s2521_s23 + $0x40] sm:$0xff] }
  0x14   : > { %1982 = vmatmul.mubr.msk.bf16.vlgmr.msra.gmra.mrb[0].mxu0 %vm398_vm0, %v354_v12  ;;  %v2284_v40 = vld [vmem:[%s3017_s3 + $0xc4] ss:$16 sps:$4 sm:$0xff]   ;;  %v2288_v41 = vld [vmem:[%s3017_s3 + $0xcc] ss:$16 sps:$4 sm:$0xff]   ;;  %v357_v42 = vpack.c.bf16 %v345_v37, %v344_v36  ;;  %v2286_v43 = vld [vmem:[%s3017_s3 + $0xc8] ss:$16 sps:$4 sm:$0xff]  }
  0x15   : > { %465 = vmatprep.mubr.bf16.mxu0 %v2432_v2  ;;  %1104 = vmatpush1.bf16.msra.mxu0 %v2250_v11  ;;  %v2289_v44 = vld [vmem:[%s3017_s3 + $0xc0] ss:$16 sps:$4 sm:$0xff]   ;;  %v2290_v45 = vld [vmem:[%s3017_s3 + $0xe4] ss:$16 sps:$4 sm:$0xff]   ;;  %v2294_v46 = vld [vmem:[%s3017_s3 + $0xec] ss:$16 sps:$4 sm:$0xff]  }
  0x16   : > { %1105 = vmatprep.subr.bf16.mxu0 %v2258_v16  ;;  %997 = vmatpush1.bf16.msra.mxu1 %v2271_v27  ;;  %v347_v48 = vld [vmem:[%s2521_s23 + $0x48] sm:$0xff]  ;;  %v2295_v49 = vld [vmem:[%s3017_s3 + $0xe0] ss:$16 sps:$4 sm:$0xff]   ;;  %v2296_v51 = vld [vmem:[%s3017_s3 + $0x104] ss:$16 sps:$4 sm:$0xff]  }
  0x17   : > { %998 = vmatprep.subr.bf16.mxu1 %v2272_v29  ;;  %v2292_v50 = vld [vmem:[%s3017_s3 + $0xe8] ss:$16 sps:$4 sm:$0xff]   ;;  %v2300_v52 = vld [vmem:[%s3017_s3 + $0x10c] ss:$16 sps:$4 sm:$0xff]   ;;  %v358_v53 = vpack.c.bf16 %v347_v48, %v346_v47  ;;  %v2301_v55 = vld [vmem:[%s3017_s3 + $0x100] ss:$16 sps:$4 sm:$0xff]  }
  0x18   : > { %v2298_v54 = vld [vmem:[%s3017_s3 + $0x108] ss:$16 sps:$4 sm:$0xff]   ;;  %v2302_v56 = vld [vmem:[%s3017_s3 + $0x124] ss:$16 sps:$4 sm:$0xff]   ;;  %v2306_v58 = vld [vmem:[%s3017_s3 + $0x12c] ss:$16 sps:$4 sm:$0xff]  }
  0x19   : > { %1106 = vmatpush1.bf16.msra.mxu0 %v2256_v15  ;;  %v348_v57 = vld [vmem:[%s2521_s23 + $0x50] sm:$0xff]  ;;  %v349_v59 = vld [vmem:[%s2521_s23 + $0x58] sm:$0xff]  ;;  %v350_v6 = vld [vmem:[%s2521_s23 + $0x60] sm:$0xff] }
  0x1a   : > { %1107 = vmatprep.subr.bf16.mxu0 %v2264_v21  ;;  %999 = vmatpush1.bf16.msra.mxu1 %v2277_v33  ;;  %v2304_v60 = vld [vmem:[%s3017_s3 + $0x128] ss:$16 sps:$4 sm:$0xff]   ;;  %v2307_v61 = vld [vmem:[%s3017_s3 + $0x120] ss:$16 sps:$4 sm:$0xff]   ;;  %v2308_v62 = vld [vmem:[%s3017_s3 + $0x144] ss:$16 sps:$4 sm:$0xff]   ;;  %v359_v1 = vpack.c.bf16 %v349_v59, %v348_v57 }
  0x1b   : > { %1000 = vmatprep.subr.bf16.mxu1 %v2278_v34  ;;  %v2312_v63 = vld [vmem:[%s3017_s3 + $0x14c] ss:$16 sps:$4 sm:$0xff]   ;;  %v2313_v0 = vld [vmem:[%s3017_s3 + $0x140] ss:$16 sps:$4 sm:$0xff]   ;;  %v2310_v3 = vld [vmem:[%s3017_s3 + $0x148] ss:$16 sps:$4 sm:$0xff]  }
  0x1c   : > { %1983 = vmatmul.mubr.msk.bf16.gmra.mrb[4].mxu0 %vm398_vm0, %v355_v18  ;;  %v2314_v4 = vld [vmem:[%s3017_s3 + $0x164] ss:$16 sps:$4 sm:$0xff]   ;;  %v2318_v5 = vld [vmem:[%s3017_s3 + $0x16c] ss:$16 sps:$4 sm:$0xff]   ;;  %v2319_v8 = vld [vmem:[%s3017_s3 + $0x160] ss:$16 sps:$4 sm:$0xff]  }
  0x1d   : > { %475 = vmatprep.mubr.bf16.mxu0 %v2432_v2  ;;  %1108 = vmatpush1.bf16.msra.mxu0 %v2262_v20  ;;  %v351_v7 = vld [vmem:[%s2521_s23 + $0x68] sm:$0xff]  ;;  %v2320_v10 = vld [vmem:[%s3017_s3 + $0x184] ss:$16 sps:$4 sm:$0xff]   ;;  %v2325_v12 = vld [vmem:[%s3017_s3 + $0x180] ss:$16 sps:$4 sm:$0xff]  }
  0x1e   : > { %1109 = vmatprep.subr.bf16.mxu0 %v2270_v26  ;;  %1001 = vmatpush1.bf16.msra.mxu1 %v2283_v38  ;;  %v2316_v9 = vld [vmem:[%s3017_s3 + $0x168] ss:$16 sps:$4 sm:$0xff]   ;;  %v2324_v11 = vld [vmem:[%s3017_s3 + $0x18c] ss:$16 sps:$4 sm:$0xff]   ;;  %v360_v13 = vpack.c.bf16 %v351_v7, %v350_v6  ;;  %v2326_v15 = vld [vmem:[%s3017_s3 + $0x1a4] ss:$16 sps:$4 sm:$0xff]  }
  0x1f   : > { %1002 = vmatprep.subr.bf16.mxu1 %v2284_v40  ;;  %v2322_v14 = vld [vmem:[%s3017_s3 + $0x188] ss:$16 sps:$4 sm:$0xff]   ;;  %v2330_v16 = vld [vmem:[%s3017_s3 + $0x1ac] ss:$16 sps:$4 sm:$0xff]   ;;  %v352_v17 = vld [vmem:[%s2521_s23 + $0x70] sm:$0xff] }
  0x20   : > { %v353_v18 = vld [vmem:[%s2521_s23 + $0x78] sm:$0xff]  ;;  %v2331_v21 = vld [vmem:[%s3017_s3 + $0x1a0] ss:$16 sps:$4 sm:$0xff]   ;;  %v2332_v22 = vld [vmem:[%s3017_s3 + $0x1c4] ss:$16 sps:$4 sm:$0xff]  }
  0x21   : > { %1110 = vmatpush1.bf16.msra.mxu0 %v2268_v28  ;;  %v2328_v19 = vld [vmem:[%s3017_s3 + $0x1a8] ss:$16 sps:$4 sm:$0xff]   ;;  %v361_v20 = vpack.c.bf16 %v353_v18, %v352_v17  ;;  %v2337_v24 = vld [vmem:[%s3017_s3 + $0x1c0] ss:$16 sps:$4 sm:$0xff]   ;;  %v2338_v25 = vld [vmem:[%s3017_s3 + $0x1e4] ss:$16 sps:$4 sm:$0xff]  }
  0x22   : > { %1111 = vmatprep.subr.bf16.mxu0 %v2276_v30  ;;  %1003 = vmatpush1.bf16.msra.mxu1 %v2289_v44  ;;  %v2334_v23 = vld [vmem:[%s3017_s3 + $0x1c8] ss:$16 sps:$4 sm:$0xff]   ;;  %v2342_v26 = vld [vmem:[%s3017_s3 + $0x1ec] ss:$16 sps:$4 sm:$0xff]   ;;  %v2343_v28 = vld [vmem:[%s3017_s3 + $0x1e0] ss:$16 sps:$4 sm:$0xff]  }
  0x23   : > { %1004 = vmatprep.subr.bf16.mxu1 %v2290_v45  ;;  %v2340_v27 = vld [vmem:[%s3017_s3 + $0x1e8] ss:$16 sps:$4 sm:$0xff]   ;;  %v2344_v29 = vld [vmem:[%s3019_s5 + $0x40] sm:$0xff]   ;;  %v2354_v6 = vld [vmem:[%s3019_s5 + $0xd0] sm:$0xff]  }
  0x24   : > { %1984 = vmatmul.mubr.msk.bf16.gmra.mrb[8].mxu0 %vm398_vm0, %v356_v31  ;;  %v2346_v30 = vld [vmem:[%s3019_s5 + $0xc0] sm:$0xff]   ;;  %v368_v31 = vlaneseq  ;;  %v2348_v57 = vld [vmem:[%s3019_s5 + $0x48] sm:$0xff]   ;;  %v2358_v17 = vld [vmem:[%s3019_s5 + $0xd8] sm:$0xff]  }
  0x25   : > { %485 = vmatprep.mubr.bf16.mxu0 %v2432_v2  ;;  %1112 = vmatpush1.bf16.msra.mxu0 %v2274_v32  ;;  %v366_v34 = vld [vmem:[%s3016_s2] sm:$0x3] }
  0x26   : > { %1113 = vmatprep.subr.bf16.mxu0 %v2282_v35  ;;  %1005 = vmatpush1.bf16.msra.mxu1 %v2295_v49  ;;  %v2743_v32 = vshrl.u32 %v368_v31, 7 }
  0x27   : > { %1006 = vmatprep.subr.bf16.mxu1 %v2296_v51 }
  0x28   : > { %v370_v33 = vsub.s32 0, %v2743_v32  ;;  %v374_v35 = vsub.s32 1, %v2743_v32 }
  0x29   : > { %1114 = vmatpush1.bf16.msra.mxu0 %v2280_v39 }
  0x2a   : > { %1115 = vmatprep.subr.bf16.mxu0 %v2288_v41  ;;  %1007 = vmatpush1.bf16.msra.mxu1 %v2301_v55  ;;  %v2752_v36 = vrot.slane %v366_v34, %v370_v33  ;;  %v2756_v37 = vrot.slane %v366_v34, %v374_v35 }
  0x2b   : > { %1008 = vmatprep.subr.bf16.mxu1 %v2302_v56 }
  0x2c   : > { %1985 = vmatmul.mubr.msk.bf16.gmra.mrb[12].mxu0 %vm398_vm0, %v357_v42 }
  0x2d   : > { %495 = vmatprep.mubr.bf16.mxu0 %v2432_v2  ;;  %1116 = vmatpush1.bf16.msra.mxu0 %v2286_v43 }
  0x2e   : > { %1117 = vmatprep.subr.bf16.mxu0 %v2294_v46  ;;  %1009 = vmatpush1.bf16.msra.mxu1 %v2307_v61 }
  0x2f   : > { %1010 = vmatprep.subr.bf16.mxu1 %v2308_v62 }
  0x31   : > { %1118 = vmatpush1.bf16.msra.mxu0 %v2292_v50 }
  0x32   : > { %1119 = vmatprep.subr.bf16.mxu0 %v2300_v52  ;;  %1011 = vmatpush1.bf16.msra.mxu1 %v2313_v0  ;;  %v2349_v0 = vld [vmem:[%s3019_s5 + $0x8] sm:$0xff]  }
  0x33   : > { %1012 = vmatprep.subr.bf16.mxu1 %v2314_v4 }
  0x34   : > { %1986 = vmatmul.mubr.msk.bf16.gmra.mrb[16].mxu0 %vm398_vm0, %v358_v53  ;;  %v2345_v53 = vld [vmem:[%s3019_s5] sm:$0xff]  }
  0x35   : > { %505 = vmatprep.mubr.bf16.mxu0 %v2432_v2  ;;  %1120 = vmatpush1.bf16.msra.mxu0 %v2298_v54  ;;  %v2347_v54 = vld [vmem:[%s3019_s5 + $0x80] sm:$0xff]  }
  0x36   : > { %1121 = vmatprep.subr.bf16.mxu0 %v2306_v58  ;;  %1013 = vmatpush1.bf16.msra.mxu1 %v2319_v8  ;;  %v2350_v58 = vld [vmem:[%s3019_s5 + $0xc8] sm:$0xff]  }
  0x37   : > { %1014 = vmatprep.subr.bf16.mxu1 %v2320_v10 }
  0x39   : > { %1122 = vmatpush1.bf16.msra.mxu0 %v2304_v60 }
  0x3a   : > { %1123 = vmatprep.subr.bf16.mxu0 %v2312_v63  ;;  %1015 = vmatpush1.bf16.msra.mxu1 %v2325_v12  ;;  %v2353_v12 = vld [vmem:[%s3019_s5 + $0x10] sm:$0xff]  }
  0x3b   : > { %1016 = vmatprep.subr.bf16.mxu1 %v2326_v15 }
  0x3c   : > { %1987 = vmatmul.mubr.msk.bf16.gmra.mrb[20].mxu0 %vm398_vm0, %v359_v1  ;;  %v2351_v1 = vld [vmem:[%s3019_s5 + $0x88] sm:$0xff]  }
  0x3d   : > { %515 = vmatprep.mubr.bf16.mxu0 %v2432_v2  ;;  %1124 = vmatpush1.bf16.msra.mxu0 %v2310_v3 }
  0x3e   : > { %1125 = vmatprep.subr.bf16.mxu0 %v2318_v5  ;;  %1017 = vmatpush1.bf16.msra.mxu1 %v2331_v21  ;;  %v2352_v5 = vld [vmem:[%s3019_s5 + $0x50] sm:$0xff]  }
  0x3f   : > { %1018 = vmatprep.subr.bf16.mxu1 %v2332_v22 }
  0x41   : > { %1126 = vmatpush1.bf16.msra.mxu0 %v2316_v9 }
  0x42   : > { %1127 = vmatprep.subr.bf16.mxu0 %v2324_v11  ;;  %1019 = vmatpush1.bf16.msra.mxu1 %v2337_v24 }
  0x43   : > { %1020 = vmatprep.subr.bf16.mxu1 %v2338_v25 }
  0x44   : > { %1988 = vmatmul.mubr.msk.bf16.gmra.mrb[24].mxu0 %vm398_vm0, %v360_v13  ;;  %v2355_v13 = vld [vmem:[%s3019_s5 + $0x90] sm:$0xff]  }
  0x45   : > { %525 = vmatprep.mubr.bf16.mxu0 %v2432_v2  ;;  %1128 = vmatpush1.bf16.msra.mxu0 %v2322_v14  ;;  %v2336_v2 = vld [vmem:[%s3017_s3 + $0x1cc] ss:$16 sps:$4 sm:$0xff]  }
  0x46   : > { %1129 = vmatprep.subr.bf16.mxu0 %v2330_v16  ;;  %1021 = vmatpush1.bf16.msra.mxu1 %v2343_v28  ;;  %v2356_v16 = vld [vmem:[%s3019_s5 + $0x58] sm:$0xff]  }
  0x47   : > { %2089 = vmatprep.subr.bf16.mxu1 %v2344_v29 }
  0x49   : > { %1130 = vmatpush1.bf16.msra.mxu0 %v2328_v19 }
  0x4a   : > { %1131 = vmatprep.subr.bf16.mxu0 %v2336_v2  ;;  %v2357_v2 = vld [vmem:[%s3019_s5 + $0x18] sm:$0xff]  }
  0x4c   : > { %1989 = vmatmul.mubr.msk.bf16.gmra.mrb[28].mxu0 %vm398_vm0, %v361_v20 }
  0x4d   : > { %1132 = vmatpush1.bf16.msra.mxu0 %v2334_v23  ;;  %v2359_v23 = vld [vmem:[%s3019_s5 + $0x98] sm:$0xff]  }
  0x4e   : > { %1133 = vmatprep.subr.bf16.mxu0 %v2342_v26  ;;  %v2360_v26 = vld [vmem:[%s3019_s5 + $0x60] sm:$0xff]  }
  0x51   : > { %1134 = vmatpush1.bf16.msra.mxu0 %v2340_v27  ;;  %v2362_v27 = vld [vmem:[%s3019_s5 + $0xe0] sm:$0xff]  }
  0x52   : > { %2153 = vmatprep.subr.bf16.mxu0 %v2346_v30 }
  0xe7   : > { %v457_v38 = vpop.f32.mrb[0].mxu0 }
  0xe8   : > { %v458_v39 = vadd.f32 %v457_v38, %v2752_v36  ;;  %v459_v40 = vpop.f32.mrb[1].mxu0  ;;  %v2361_v38 = vld [vmem:[%s3019_s5 + $0x20] sm:$0xff]  }
  0xe9   : > { %v460_v41 = vadd.f32 %v459_v40, %v2756_v37  ;;  %v461_v42 = vpop.f32.mrb[2].mxu0 }
  0xea   : > { %v462_v43 = vadd.f32 %v461_v42, %v2752_v36  ;;  %v463_v44 = vpop.f32.mrb[3].mxu0  ;;  %v536_v46 = vmax.f32 %v458_v39, 0.0  ;;  %v2363_v39 = vld [vmem:[%s3019_s5 + $0xa0] sm:$0xff]   ;;  %v2364_v42 = vld [vmem:[%s3019_s5 + $0x68] sm:$0xff]  }
  0xeb   : > { %v464_v45 = vadd.f32 %v463_v44, %v2756_v37  ;;  %v537_v48 = vmax.f32 %v460_v41, 0.0 }
  0xec   : > { %v538_v47 = vmax.f32 %v462_v43, 0.0  ;;  %v2366_v43 = vld [vmem:[%s3019_s5 + $0xe8] sm:$0xff]  }
  0xed   : > { %v539_v49 = vmax.f32 %v464_v45, 0.0 }
  0xee   : > { %v568_v50 = vpack.c.bf16 %v538_v47, %v536_v46 }
  0xef   : > { %v467_v51 = vpop.f32.mrb[4].mxu0  ;;  %v569_v52 = vpack.c.bf16 %v539_v49, %v537_v48  ;;  %v2365_v49 = vld [vmem:[%s3019_s5 + $0x28] sm:$0xff]  }
  0xf0   : > { %v468_v55 = vadd.f32 %v467_v51, %v2752_v36  ;;  %v469_v56 = vpop.f32.mrb[5].mxu0 }
  0xf1   : > { %v470_v59 = vadd.f32 %v469_v56, %v2756_v37  ;;  %v471_v60 = vpop.f32.mrb[6].mxu0  ;;  %1022 = vmatprep.mubr.bf16.mxu1 %v569_v52  ;;  %1135 = vmatprep.mubr.bf16.mxu0 %v569_v52 }
  0xf2   : > { %v472_v61 = vadd.f32 %v471_v60, %v2752_v36  ;;  %v473_v62 = vpop.f32.mrb[7].mxu0  ;;  %1023 = vmatmul.mubr.bf16.vlgmr.msra.gmra.mrb[0].mxu1 %v568_v50  ;;  %1136 = vmatmul.mubr.bf16.vlgmr.msra.gmra.mrb[32].mxu0 %v568_v50  ;;  %v540_v3 = vmax.f32 %v468_v55, 0.0  ;;  %v2367_v50 = vld [vmem:[%s3019_s5 + $0xa8] sm:$0xff]   ;;  %v2369_v60 = vld [vmem:[%s3019_s5 + $0x30] sm:$0xff]  }
  0xf3   : > { %v474_v63 = vadd.f32 %v473_v62, %v2756_v37  ;;  %2090 = vmatpush3.bf16.msra.mxu1 %v2345_v53  ;;  %2154 = vmatpush3.bf16.msra.mxu0 %v2347_v54  ;;  %v541_v7 = vmax.f32 %v470_v59, 0.0  ;;  %v2368_v53 = vld [vmem:[%s3019_s5 + $0x70] sm:$0xff]  }
  0xf4   : > { %v542_v4 = vmax.f32 %v472_v61, 0.0  ;;  %2091 = vmatprep.subr.bf16.mxu1 %v2348_v57  ;;  %2155 = vmatprep.subr.bf16.mxu0 %v2350_v58  ;;  %v2370_v54 = vld [vmem:[%s3019_s5 + $0xf0] sm:$0xff]  }
  0xf5   : > { %v543_v8 = vmax.f32 %v474_v63, 0.0  ;;  %v2371_v61 = vld [vmem:[%s3019_s5 + $0xb0] sm:$0xff]  }
  0xf6   : > { %v570_v9 = vpack.c.bf16 %v542_v4, %v540_v3 }
  0xf7   : > { %v571_v10 = vpack.c.bf16 %v543_v8, %v541_v7  ;;  %v477_v11 = vpop.f32.mrb[8].mxu0  ;;  %2092 = vmatpush3.bf16.msra.mxu1 %v2349_v0  ;;  %2156 = vmatpush3.bf16.msra.mxu0 %v2351_v1 }
  0xf8   : > { %v478_v14 = vadd.f32 %v477_v11, %v2752_v36  ;;  %v479_v15 = vpop.f32.mrb[9].mxu0  ;;  %2093 = vmatprep.subr.bf16.mxu1 %v2352_v5  ;;  %2157 = vmatprep.subr.bf16.mxu0 %v2354_v6 }
  0xf9   : > { %v480_v18 = vadd.f32 %v479_v15, %v2756_v37  ;;  %v481_v19 = vpop.f32.mrb[10].mxu0  ;;  %1032 = vmatprep.mubr.bf16.mxu1 %v571_v10  ;;  %1145 = vmatprep.mubr.bf16.mxu0 %v571_v10 }
  0xfa   : > { %v482_v20 = vadd.f32 %v481_v19, %v2752_v36  ;;  %v483_v21 = vpop.f32.mrb[11].mxu0  ;;  %1033 = vmatmul.mubr.bf16.gmra.mrb[4].mxu1 %v570_v9  ;;  %1146 = vmatmul.mubr.bf16.gmra.mrb[36].mxu0 %v570_v9  ;;  %v544_v24 = vmax.f32 %v478_v14, 0.0 }
  0xfb   : > { %v484_v22 = vadd.f32 %v483_v21, %v2756_v37  ;;  %2094 = vmatpush3.bf16.msra.mxu1 %v2353_v12  ;;  %2158 = vmatpush3.bf16.msra.mxu0 %v2355_v13  ;;  %v545_v28 = vmax.f32 %v480_v18, 0.0 }
  0xfc   : > { %v546_v25 = vmax.f32 %v482_v20, 0.0  ;;  %2095 = vmatprep.subr.bf16.mxu1 %v2356_v16  ;;  %2159 = vmatprep.subr.bf16.mxu0 %v2358_v17 }
  0xfd   : > { %v547_v29 = vmax.f32 %v484_v22, 0.0 }
  0xfe   : > { %v572_v30 = vpack.c.bf16 %v546_v25, %v544_v24 }
  0xff   : > { %v573_v31 = vpack.c.bf16 %v547_v29, %v545_v28  ;;  %v487_v34 = vpop.f32.mrb[12].mxu0  ;;  %2096 = vmatpush3.bf16.msra.mxu1 %v2357_v2  ;;  %2160 = vmatpush3.bf16.msra.mxu0 %v2359_v23 }
 0x100   : > { %v488_v40 = vadd.f32 %v487_v34, %v2752_v36  ;;  %v489_v41 = vpop.f32.mrb[13].mxu0  ;;  %2097 = vmatprep.subr.bf16.mxu1 %v2360_v26  ;;  %2161 = vmatprep.subr.bf16.mxu0 %v2362_v27 }
 0x101   : > { %v490_v44 = vadd.f32 %v489_v41, %v2756_v37  ;;  %v491_v45 = vpop.f32.mrb[14].mxu0  ;;  %1042 = vmatprep.mubr.bf16.mxu1 %v573_v31  ;;  %1155 = vmatprep.mubr.bf16.mxu0 %v573_v31 }
 0x102   : > { %v492_v46 = vadd.f32 %v491_v45, %v2752_v36  ;;  %v493_v47 = vpop.f32.mrb[15].mxu0  ;;  %1043 = vmatmul.mubr.bf16.gmra.mrb[8].mxu1 %v572_v30  ;;  %1156 = vmatmul.mubr.bf16.gmra.mrb[40].mxu0 %v572_v30  ;;  %v548_v51 = vmax.f32 %v488_v40, 0.0 }
 0x103   : > { %v494_v48 = vadd.f32 %v493_v47, %v2756_v37  ;;  %2098 = vmatpush3.bf16.msra.mxu1 %v2361_v38  ;;  %2162 = vmatpush3.bf16.msra.mxu0 %v2363_v39  ;;  %v549_v55 = vmax.f32 %v490_v44, 0.0 }
 0x104   : > { %v550_v52 = vmax.f32 %v492_v46, 0.0  ;;  %2099 = vmatprep.subr.bf16.mxu1 %v2364_v42  ;;  %2163 = vmatprep.subr.bf16.mxu0 %v2366_v43 }
 0x105   : > { %v551_v56 = vmax.f32 %v494_v48, 0.0 }
 0x106   : > { %v574_v57 = vpack.c.bf16 %v550_v52, %v548_v51 }
 0x107   : > { %v575_v58 = vpack.c.bf16 %v551_v56, %v549_v55  ;;  %v497_v59 = vpop.f32.mrb[16].mxu0  ;;  %2100 = vmatpush3.bf16.msra.mxu1 %v2365_v49  ;;  %2164 = vmatpush3.bf16.msra.mxu0 %v2367_v50 }
 0x108   : > { %v498_v62 = vadd.f32 %v497_v59, %v2752_v36  ;;  %v499_v63 = vpop.f32.mrb[17].mxu0  ;;  %2101 = vmatprep.subr.bf16.mxu1 %v2368_v53  ;;  %2165 = vmatprep.subr.bf16.mxu0 %v2370_v54  ;;  %v2375_v59 = vld [vmem:[%s3019_s5 + $0xb8] sm:$0xff]  }
 0x109   : > { %v500_v0 = vadd.f32 %v499_v63, %v2756_v37  ;;  %v501_v1 = vpop.f32.mrb[18].mxu0  ;;  %1052 = vmatprep.mubr.bf16.mxu1 %v575_v58  ;;  %1165 = vmatprep.mubr.bf16.mxu0 %v575_v58  ;;  %v2372_v58 = vld [vmem:[%s3019_s5 + $0x78] sm:$0xff]  }
 0x10a   : > { %v502_v3 = vadd.f32 %v501_v1, %v2752_v36  ;;  %v503_v4 = vpop.f32.mrb[19].mxu0  ;;  %1053 = vmatmul.mubr.bf16.gmra.mrb[12].mxu1 %v574_v57  ;;  %1166 = vmatmul.mubr.bf16.gmra.mrb[44].mxu0 %v574_v57  ;;  %v552_v6 = vmax.f32 %v498_v62, 0.0  ;;  %v664_v62 = vsub.s32 3, %v2743_v32 }
 0x10b   : > { %v504_v5 = vadd.f32 %v503_v4, %v2756_v37  ;;  %2102 = vmatpush3.bf16.msra.mxu1 %v2369_v60  ;;  %2166 = vmatpush3.bf16.msra.mxu0 %v2371_v61  ;;  %v553_v8 = vmax.f32 %v500_v0, 0.0  ;;  %v660_v60 = vsub.s32 2, %v2743_v32  ;;  %v648_v61 = vld [vmem:[%s3018_s4] sm:$0xf] }
 0x10c   : > { %v554_v7 = vmax.f32 %v502_v3, 0.0  ;;  %2103 = vmatprep.subr.bf16.mxu1 %v2372_v58  ;;  %v2887_v63 = vrot.slane %v648_v61, %v370_v33  ;;  %v2893_v1 = vrot.slane %v648_v61, %v374_v35  ;;  %v2895_v3 = vrot.slane %v648_v61, %v664_v62 }
 0x10d   : > { %v555_v9 = vmax.f32 %v504_v5, 0.0  ;;  %v2889_v0 = vrot.slane %v648_v61, %v660_v60 }
 0x10e   : > { %v576_v10 = vpack.c.bf16 %v554_v7, %v552_v6 }
 0x10f   : > { %v577_v11 = vpack.c.bf16 %v555_v9, %v553_v8  ;;  %v507_v12 = vpop.f32.mrb[20].mxu0 }
 0x110   : > { %v508_v13 = vadd.f32 %v507_v12, %v2752_v36  ;;  %v509_v14 = vpop.f32.mrb[21].mxu0 }
 0x111   : > { %v510_v15 = vadd.f32 %v509_v14, %v2756_v37  ;;  %v511_v16 = vpop.f32.mrb[22].mxu0  ;;  %1062 = vmatprep.mubr.bf16.mxu1 %v577_v11  ;;  %1175 = vmatprep.mubr.bf16.mxu0 %v577_v11 }
 0x112   : > { %v512_v17 = vadd.f32 %v511_v16, %v2752_v36  ;;  %v513_v18 = vpop.f32.mrb[23].mxu0  ;;  %1063 = vmatmul.mubr.bf16.gmra.mrb[16].mxu1 %v576_v10  ;;  %1176 = vmatmul.mubr.bf16.gmra.mrb[48].mxu0 %v576_v10  ;;  %v556_v20 = vmax.f32 %v508_v13, 0.0 }
 0x113   : > { %v514_v19 = vadd.f32 %v513_v18, %v2756_v37  ;;  %v557_v22 = vmax.f32 %v510_v15, 0.0 }
 0x114   : > { %v558_v21 = vmax.f32 %v512_v17, 0.0 }
 0x115   : > { %v559_v2 = vmax.f32 %v514_v19, 0.0 }
 0x116   : > { %v578_v23 = vpack.c.bf16 %v558_v21, %v556_v20 }
 0x117   : > { %v579_v24 = vpack.c.bf16 %v559_v2, %v557_v22  ;;  %v517_v25 = vpop.f32.mrb[24].mxu0 }
 0x118   : > { %v518_v26 = vadd.f32 %v517_v25, %v2752_v36  ;;  %v519_v27 = vpop.f32.mrb[25].mxu0 }
 0x119   : > { %v520_v28 = vadd.f32 %v519_v27, %v2756_v37  ;;  %v521_v29 = vpop.f32.mrb[26].mxu0  ;;  %1072 = vmatprep.mubr.bf16.mxu1 %v579_v24  ;;  %1185 = vmatprep.mubr.bf16.mxu0 %v579_v24 }
 0x11a   : > { %v522_v30 = vadd.f32 %v521_v29, %v2752_v36  ;;  %v523_v31 = vpop.f32.mrb[27].mxu0  ;;  %1073 = vmatmul.mubr.bf16.gmra.mrb[20].mxu1 %v578_v23  ;;  %1186 = vmatmul.mubr.bf16.gmra.mrb[52].mxu0 %v578_v23  ;;  %v560_v38 = vmax.f32 %v518_v26, 0.0 }
 0x11b   : > { %v524_v34 = vadd.f32 %v523_v31, %v2756_v37  ;;  %v561_v40 = vmax.f32 %v520_v28, 0.0 }
 0x11c   : > { %v562_v39 = vmax.f32 %v522_v30, 0.0 }
 0x11d   : > { %v563_v41 = vmax.f32 %v524_v34, 0.0 }
 0x11e   : > { %v580_v42 = vpack.c.bf16 %v562_v39, %v560_v38 }
 0x11f   : > { %v581_v43 = vpack.c.bf16 %v563_v41, %v561_v40  ;;  %v527_v44 = vpop.f32.mrb[28].mxu0 }
 0x120   : > { %v528_v45 = vadd.f32 %v527_v44, %v2752_v36  ;;  %v529_v46 = vpop.f32.mrb[29].mxu0 }
 0x121   : > { %v530_v47 = vadd.f32 %v529_v46, %v2756_v37  ;;  %v531_v48 = vpop.f32.mrb[30].mxu0  ;;  %1082 = vmatprep.mubr.bf16.mxu1 %v581_v43  ;;  %1195 = vmatprep.mubr.bf16.mxu0 %v581_v43 }
 0x122   : > { %v532_v49 = vadd.f32 %v531_v48, %v2752_v36  ;;  %v533_v50 = vpop.f32.mrb[31].mxu0  ;;  %1083 = vmatmul.mubr.bf16.gmra.mrb[24].mxu1 %v580_v42  ;;  %1196 = vmatmul.mubr.bf16.gmra.mrb[56].mxu0 %v580_v42  ;;  %v564_v52 = vmax.f32 %v528_v45, 0.0  ;;  %v2374_v36 = vld [vmem:[%s3019_s5 + $0xf8] sm:$0xff]  }
 0x123   : > { %v534_v51 = vadd.f32 %v533_v50, %v2756_v37  ;;  %v565_v54 = vmax.f32 %v530_v47, 0.0  ;;  %v2373_v37 = vld [vmem:[%s3019_s5 + $0x38] sm:$0xff]   ;;  %2167 = vmatprep.subr.bf16.mxu0 %v2374_v36 }
 0x124   : > { %v566_v53 = vmax.f32 %v532_v49, 0.0  ;;  %2104 = vmatpush3.bf16.msra.mxu1 %v2373_v37  ;;  %2168 = vmatpush3.bf16.msra.mxu0 %v2375_v59 }
 0x125   : > { %v567_v55 = vmax.f32 %v534_v51, 0.0 }
 0x126   : > { %v582_v56 = vpack.c.bf16 %v566_v53, %v564_v52 }
 0x127   : > { %v583_v57 = vpack.c.bf16 %v567_v55, %v565_v54 }
 0x129   : > { %1092 = vmatprep.mubr.bf16.mxu1 %v583_v57  ;;  %1205 = vmatprep.mubr.bf16.mxu0 %v583_v57 }
 0x12a   : > { %1093 = vmatmul.mubr.bf16.gmra.mrb[28].mxu1 %v582_v56  ;;  %1206 = vmatmul.mubr.bf16.gmra.mrb[60].mxu0 %v582_v56 }
 0x1c5   : > { %v1024_v4 = vpop.f32.mrb[0].mxu1  ;;  %v1137_v5 = vpop.f32.mrb[32].mxu0 }
 0x1c6   : > { %v1025_v6 = vadd.f32 %v1024_v4, %v2887_v63  ;;  %v1138_v7 = vadd.f32 %v1137_v5, %v2889_v0  ;;  %v1026_v8 = vpop.f32.mrb[1].mxu1  ;;  %v1139_v9 = vpop.f32.mrb[33].mxu0 }
 0x1c7   : > { %v1027_v10 = vadd.f32 %v1026_v8, %v2893_v1  ;;  %v1140_v33 = vadd.f32 %v1139_v9, %v2895_v3  ;;  %v1028_v11 = vpop.f32.mrb[2].mxu1  ;;  %v1141_v12 = vpop.f32.mrb[34].mxu0 }
 0x1c8   : > { %v1029_v32 = vadd.f32 %v1028_v11, %v2887_v63  ;;  %v1142_v35 = vadd.f32 %v1141_v12, %v2889_v0  ;;  %v1030_v13 = vpop.f32.mrb[3].mxu1  ;;  %v1143_v14 = vpop.f32.mrb[35].mxu0  ;;  %v1216_v17 = vmax.f32 %v1025_v6, 0.0  ;;  %v1218_v18 = vmax.f32 %v1138_v7, 0.0 }
 0x1c9   : > { %v1031_v15 = vadd.f32 %v1030_v13, %v2893_v1  ;;  %v1144_v16 = vadd.f32 %v1143_v14, %v2895_v3  ;;  %v1217_v21 = vmax.f32 %v1027_v10, 0.0  ;;  %v1219_v22 = vmax.f32 %v1140_v33, 0.0 }
 0x1ca   : > { %v1220_v19 = vmax.f32 %v1029_v32, 0.0  ;;  %v1222_v20 = vmax.f32 %v1142_v35, 0.0 }
 0x1cb   : > { %v1221_v2 = vmax.f32 %v1031_v15, 0.0  ;;  %v1223_v23 = vmax.f32 %v1144_v16, 0.0 }
 0x1cc   : > { %v1280_v24 = vpack.c.bf16 %v1220_v19, %v1216_v17  ;;  %v1282_v25 = vpack.c.bf16 %v1222_v20, %v1218_v18 }
 0x1cd   : > { %v1281_v26 = vpack.c.bf16 %v1221_v2, %v1217_v21  ;;  %v1283_v27 = vpack.c.bf16 %v1223_v23, %v1219_v22  ;;  %v1034_v28 = vpop.f32.mrb[4].mxu1  ;;  %v1147_v29 = vpop.f32.mrb[36].mxu0 }
 0x1ce   : > { %v1035_v30 = vadd.f32 %v1034_v28, %v2887_v63  ;;  %v1148_v31 = vadd.f32 %v1147_v29, %v2889_v0  ;;  %v1036_v34 = vpop.f32.mrb[5].mxu1  ;;  %v1149_v38 = vpop.f32.mrb[37].mxu0 }
 0x1cf   : > { %v1037_v39 = vadd.f32 %v1036_v34, %v2893_v1  ;;  %v1150_v40 = vadd.f32 %v1149_v38, %v2895_v3  ;;  %v1038_v41 = vpop.f32.mrb[6].mxu1  ;;  %v1151_v42 = vpop.f32.mrb[38].mxu0  ;;  %1671 = vmatprep.mubr.bf16.mxu1 %v1281_v26  ;;  %1768 = vmatprep.mubr.bf16.mxu0 %v1283_v27 }
 0x1d0   : > { %v1039_v43 = vadd.f32 %v1038_v41, %v2887_v63  ;;  %v1152_v44 = vadd.f32 %v1151_v42, %v2889_v0  ;;  %v1040_v45 = vpop.f32.mrb[7].mxu1  ;;  %v1153_v46 = vpop.f32.mrb[39].mxu0  ;;  %1672 = vmatmul.mubr.bf16.vlgmr.msra.gmra.mrb[32].mxu1 %v1280_v24  ;;  %1769 = vmatmul.mubr.bf16.vlgmr.msra.gmra.mrb[64].mxu0 %v1282_v25  ;;  %v1224_v49 = vmax.f32 %v1035_v30, 0.0  ;;  %v1226_v50 = vmax.f32 %v1148_v31, 0.0 }
 0x1d1   : > { %v1041_v47 = vadd.f32 %v1040_v45, %v2893_v1  ;;  %v1154_v48 = vadd.f32 %v1153_v46, %v2895_v3  ;;  %v1225_v53 = vmax.f32 %v1037_v39, 0.0  ;;  %v1227_v54 = vmax.f32 %v1150_v40, 0.0 }
 0x1d2   : > { %v1228_v51 = vmax.f32 %v1039_v43, 0.0  ;;  %v1230_v52 = vmax.f32 %v1152_v44, 0.0 }
 0x1d3   : > { %v1229_v55 = vmax.f32 %v1041_v47, 0.0  ;;  %v1231_v56 = vmax.f32 %v1154_v48, 0.0 }
 0x1d4   : > { %v1284_v57 = vpack.c.bf16 %v1228_v51, %v1224_v49  ;;  %v1286_v58 = vpack.c.bf16 %v1230_v52, %v1226_v50 }
 0x1d5   : > { %v1285_v36 = vpack.c.bf16 %v1229_v55, %v1225_v53  ;;  %v1287_v37 = vpack.c.bf16 %v1231_v56, %v1227_v54  ;;  %v1044_v59 = vpop.f32.mrb[8].mxu1  ;;  %v1157_v60 = vpop.f32.mrb[40].mxu0 }
 0x1d6   : > { %v1045_v61 = vadd.f32 %v1044_v59, %v2887_v63  ;;  %v1158_v62 = vadd.f32 %v1157_v60, %v2889_v0  ;;  %v1046_v4 = vpop.f32.mrb[9].mxu1  ;;  %v1159_v5 = vpop.f32.mrb[41].mxu0 }
 0x1d7   : > { %v1047_v6 = vadd.f32 %v1046_v4, %v2893_v1  ;;  %v1160_v7 = vadd.f32 %v1159_v5, %v2895_v3  ;;  %v1048_v8 = vpop.f32.mrb[10].mxu1  ;;  %v1161_v9 = vpop.f32.mrb[42].mxu0  ;;  %1679 = vmatprep.mubr.bf16.mxu1 %v1285_v36  ;;  %1776 = vmatprep.mubr.bf16.mxu0 %v1287_v37 }
 0x1d8   : > { %v1049_v10 = vadd.f32 %v1048_v8, %v2887_v63  ;;  %v1162_v33 = vadd.f32 %v1161_v9, %v2889_v0  ;;  %v1050_v11 = vpop.f32.mrb[11].mxu1  ;;  %v1163_v12 = vpop.f32.mrb[43].mxu0  ;;  %1680 = vmatmul.mubr.bf16.gmra.mrb[36].mxu1 %v1284_v57  ;;  %1777 = vmatmul.mubr.bf16.gmra.mrb[68].mxu0 %v1286_v58  ;;  %v1232_v13 = vmax.f32 %v1045_v61, 0.0  ;;  %v1234_v14 = vmax.f32 %v1158_v62, 0.0 }
 0x1d9   : > { %v1051_v32 = vadd.f32 %v1050_v11, %v2893_v1  ;;  %v1164_v35 = vadd.f32 %v1163_v12, %v2895_v3  ;;  %v1233_v17 = vmax.f32 %v1047_v6, 0.0  ;;  %v1235_v18 = vmax.f32 %v1160_v7, 0.0 }
 0x1da   : > { %v1236_v15 = vmax.f32 %v1049_v10, 0.0  ;;  %v1238_v16 = vmax.f32 %v1162_v33, 0.0 }
 0x1db   : > { %v1237_v19 = vmax.f32 %v1051_v32, 0.0  ;;  %v1239_v20 = vmax.f32 %v1164_v35, 0.0 }
 0x1dc   : > { %v1288_v21 = vpack.c.bf16 %v1236_v15, %v1232_v13  ;;  %v1290_v22 = vpack.c.bf16 %v1238_v16, %v1234_v14 }
 0x1dd   : > { %v1289_v2 = vpack.c.bf16 %v1237_v19, %v1233_v17  ;;  %v1291_v23 = vpack.c.bf16 %v1239_v20, %v1235_v18  ;;  %v1054_v24 = vpop.f32.mrb[12].mxu1  ;;  %v1167_v25 = vpop.f32.mrb[44].mxu0 }
 0x1de   : > { %v1055_v26 = vadd.f32 %v1054_v24, %v2887_v63  ;;  %v1168_v27 = vadd.f32 %v1167_v25, %v2889_v0  ;;  %v1056_v28 = vpop.f32.mrb[13].mxu1  ;;  %v1169_v29 = vpop.f32.mrb[45].mxu0 }
 0x1df   : > { %v1057_v30 = vadd.f32 %v1056_v28, %v2893_v1  ;;  %v1170_v31 = vadd.f32 %v1169_v29, %v2895_v3  ;;  %v1058_v34 = vpop.f32.mrb[14].mxu1  ;;  %v1171_v38 = vpop.f32.mrb[46].mxu0  ;;  %1687 = vmatprep.mubr.bf16.mxu1 %v1289_v2  ;;  %1784 = vmatprep.mubr.bf16.mxu0 %v1291_v23 }
 0x1e0   : > { %v1059_v39 = vadd.f32 %v1058_v34, %v2887_v63  ;;  %v1172_v40 = vadd.f32 %v1171_v38, %v2889_v0  ;;  %v1060_v41 = vpop.f32.mrb[15].mxu1  ;;  %v1173_v42 = vpop.f32.mrb[47].mxu0  ;;  %1688 = vmatmul.mubr.bf16.gmra.mrb[40].mxu1 %v1288_v21  ;;  %1785 = vmatmul.mubr.bf16.gmra.mrb[72].mxu0 %v1290_v22  ;;  %v1240_v45 = vmax.f32 %v1055_v26, 0.0  ;;  %v1242_v46 = vmax.f32 %v1168_v27, 0.0 }
 0x1e1   : > { %v1061_v43 = vadd.f32 %v1060_v41, %v2893_v1  ;;  %v1174_v44 = vadd.f32 %v1173_v42, %v2895_v3  ;;  %v1241_v49 = vmax.f32 %v1057_v30, 0.0  ;;  %v1243_v50 = vmax.f32 %v1170_v31, 0.0 }
 0x1e2   : > { %v1244_v47 = vmax.f32 %v1059_v39, 0.0  ;;  %v1246_v48 = vmax.f32 %v1172_v40, 0.0 }
 0x1e3   : > { %v1245_v51 = vmax.f32 %v1061_v43, 0.0  ;;  %v1247_v52 = vmax.f32 %v1174_v44, 0.0 }
 0x1e4   : > { %v1292_v53 = vpack.c.bf16 %v1244_v47, %v1240_v45  ;;  %v1294_v54 = vpack.c.bf16 %v1246_v48, %v1242_v46 }
 0x1e5   : > { %v1293_v55 = vpack.c.bf16 %v1245_v51, %v1241_v49  ;;  %v1295_v56 = vpack.c.bf16 %v1247_v52, %v1243_v50  ;;  %v1064_v57 = vpop.f32.mrb[16].mxu1  ;;  %v1177_v58 = vpop.f32.mrb[48].mxu0 }
 0x1e6   : > { %v1065_v36 = vadd.f32 %v1064_v57, %v2887_v63  ;;  %v1178_v37 = vadd.f32 %v1177_v58, %v2889_v0  ;;  %v1066_v59 = vpop.f32.mrb[17].mxu1  ;;  %v1179_v60 = vpop.f32.mrb[49].mxu0 }
 0x1e7   : > { %v1067_v61 = vadd.f32 %v1066_v59, %v2893_v1  ;;  %v1180_v62 = vadd.f32 %v1179_v60, %v2895_v3  ;;  %v1068_v4 = vpop.f32.mrb[18].mxu1  ;;  %v1181_v5 = vpop.f32.mrb[50].mxu0  ;;  %1695 = vmatprep.mubr.bf16.mxu1 %v1293_v55  ;;  %1792 = vmatprep.mubr.bf16.mxu0 %v1295_v56 }
 0x1e8   : > { %v1069_v6 = vadd.f32 %v1068_v4, %v2887_v63  ;;  %v1182_v7 = vadd.f32 %v1181_v5, %v2889_v0  ;;  %v1070_v8 = vpop.f32.mrb[19].mxu1  ;;  %v1183_v9 = vpop.f32.mrb[51].mxu0  ;;  %1696 = vmatmul.mubr.bf16.gmra.mrb[44].mxu1 %v1292_v53  ;;  %1793 = vmatmul.mubr.bf16.gmra.mrb[76].mxu0 %v1294_v54  ;;  %v1248_v11 = vmax.f32 %v1065_v36, 0.0  ;;  %v1250_v12 = vmax.f32 %v1178_v37, 0.0 }
 0x1e9   : > { %v1071_v10 = vadd.f32 %v1070_v8, %v2893_v1  ;;  %v1184_v33 = vadd.f32 %v1183_v9, %v2895_v3  ;;  %v1249_v13 = vmax.f32 %v1067_v61, 0.0  ;;  %v1251_v14 = vmax.f32 %v1180_v62, 0.0 }
 0x1ea   : > { %v1252_v32 = vmax.f32 %v1069_v6, 0.0  ;;  %v1254_v35 = vmax.f32 %v1182_v7, 0.0 }
 0x1eb   : > { %v1253_v15 = vmax.f32 %v1071_v10, 0.0  ;;  %v1255_v16 = vmax.f32 %v1184_v33, 0.0 }
 0x1ec   : > { %v1296_v17 = vpack.c.bf16 %v1252_v32, %v1248_v11  ;;  %v1298_v18 = vpack.c.bf16 %v1254_v35, %v1250_v12 }
 0x1ed   : > { %v1297_v19 = vpack.c.bf16 %v1253_v15, %v1249_v13  ;;  %v1299_v20 = vpack.c.bf16 %v1255_v16, %v1251_v14  ;;  %v1074_v21 = vpop.f32.mrb[20].mxu1  ;;  %v1187_v22 = vpop.f32.mrb[52].mxu0 }
 0x1ee   : > { %v1075_v2 = vadd.f32 %v1074_v21, %v2887_v63  ;;  %v1188_v23 = vadd.f32 %v1187_v22, %v2889_v0  ;;  %v1076_v24 = vpop.f32.mrb[21].mxu1  ;;  %v1189_v25 = vpop.f32.mrb[53].mxu0 }
 0x1ef   : > { %v1077_v26 = vadd.f32 %v1076_v24, %v2893_v1  ;;  %v1190_v27 = vadd.f32 %v1189_v25, %v2895_v3  ;;  %v1078_v28 = vpop.f32.mrb[22].mxu1  ;;  %v1191_v29 = vpop.f32.mrb[54].mxu0  ;;  %1703 = vmatprep.mubr.bf16.mxu1 %v1297_v19  ;;  %1800 = vmatprep.mubr.bf16.mxu0 %v1299_v20 }
 0x1f0   : > { %v1079_v30 = vadd.f32 %v1078_v28, %v2887_v63  ;;  %v1192_v31 = vadd.f32 %v1191_v29, %v2889_v0  ;;  %v1080_v34 = vpop.f32.mrb[23].mxu1  ;;  %v1193_v38 = vpop.f32.mrb[55].mxu0  ;;  %1704 = vmatmul.mubr.bf16.gmra.mrb[48].mxu1 %v1296_v17  ;;  %1801 = vmatmul.mubr.bf16.gmra.mrb[80].mxu0 %v1298_v18  ;;  %v1256_v41 = vmax.f32 %v1075_v2, 0.0  ;;  %v1258_v42 = vmax.f32 %v1188_v23, 0.0 }
 0x1f1   : > { %v1081_v39 = vadd.f32 %v1080_v34, %v2893_v1  ;;  %v1194_v40 = vadd.f32 %v1193_v38, %v2895_v3  ;;  %v1257_v45 = vmax.f32 %v1077_v26, 0.0  ;;  %v1259_v46 = vmax.f32 %v1190_v27, 0.0 }
 0x1f2   : > { %v1260_v43 = vmax.f32 %v1079_v30, 0.0  ;;  %v1262_v44 = vmax.f32 %v1192_v31, 0.0 }
 0x1f3   : > { %v1261_v47 = vmax.f32 %v1081_v39, 0.0  ;;  %v1263_v48 = vmax.f32 %v1194_v40, 0.0 }
 0x1f4   : > { %v1300_v49 = vpack.c.bf16 %v1260_v43, %v1256_v41  ;;  %v1302_v50 = vpack.c.bf16 %v1262_v44, %v1258_v42 }
 0x1f5   : > { %v1301_v51 = vpack.c.bf16 %v1261_v47, %v1257_v45  ;;  %v1303_v52 = vpack.c.bf16 %v1263_v48, %v1259_v46  ;;  %v1084_v53 = vpop.f32.mrb[24].mxu1  ;;  %v1197_v54 = vpop.f32.mrb[56].mxu0 }
 0x1f6   : > { %v1085_v55 = vadd.f32 %v1084_v53, %v2887_v63  ;;  %v1198_v56 = vadd.f32 %v1197_v54, %v2889_v0  ;;  %v1086_v57 = vpop.f32.mrb[25].mxu1  ;;  %v1199_v58 = vpop.f32.mrb[57].mxu0 }
 0x1f7   : > { %v1087_v36 = vadd.f32 %v1086_v57, %v2893_v1  ;;  %v1200_v37 = vadd.f32 %v1199_v58, %v2895_v3  ;;  %v1088_v59 = vpop.f32.mrb[26].mxu1  ;;  %v1201_v60 = vpop.f32.mrb[58].mxu0  ;;  %1711 = vmatprep.mubr.bf16.mxu1 %v1301_v51  ;;  %1808 = vmatprep.mubr.bf16.mxu0 %v1303_v52 }
 0x1f8   : > { %v1089_v61 = vadd.f32 %v1088_v59, %v2887_v63  ;;  %v1202_v62 = vadd.f32 %v1201_v60, %v2889_v0  ;;  %v1090_v4 = vpop.f32.mrb[27].mxu1  ;;  %v1203_v5 = vpop.f32.mrb[59].mxu0  ;;  %1712 = vmatmul.mubr.bf16.gmra.mrb[52].mxu1 %v1300_v49  ;;  %1809 = vmatmul.mubr.bf16.gmra.mrb[84].mxu0 %v1302_v50  ;;  %v1264_v8 = vmax.f32 %v1085_v55, 0.0  ;;  %v1266_v9 = vmax.f32 %v1198_v56, 0.0 }
 0x1f9   : > { %v1091_v6 = vadd.f32 %v1090_v4, %v2893_v1  ;;  %v1204_v7 = vadd.f32 %v1203_v5, %v2895_v3  ;;  %v1265_v11 = vmax.f32 %v1087_v36, 0.0  ;;  %v1267_v12 = vmax.f32 %v1200_v37, 0.0 }
 0x1fa   : > { %v1268_v10 = vmax.f32 %v1089_v61, 0.0  ;;  %v1270_v33 = vmax.f32 %v1202_v62, 0.0 }
 0x1fb   : > { %v1269_v32 = vmax.f32 %v1091_v6, 0.0  ;;  %v1271_v35 = vmax.f32 %v1204_v7, 0.0 }
 0x1fc   : > { %v1304_v13 = vpack.c.bf16 %v1268_v10, %v1264_v8  ;;  %v1306_v14 = vpack.c.bf16 %v1270_v33, %v1266_v9 }
 0x1fd   : > { %v1305_v15 = vpack.c.bf16 %v1269_v32, %v1265_v11  ;;  %v1307_v16 = vpack.c.bf16 %v1271_v35, %v1267_v12  ;;  %v1094_v17 = vpop.f32.mrb[28].mxu1  ;;  %v1207_v18 = vpop.f32.mrb[60].mxu0 }
 0x1fe   : > { %v1095_v19 = vadd.f32 %v1094_v17, %v2887_v63  ;;  %v1208_v20 = vadd.f32 %v1207_v18, %v2889_v0  ;;  %v1096_v21 = vpop.f32.mrb[29].mxu1  ;;  %v1209_v22 = vpop.f32.mrb[61].mxu0 }
 0x1ff   : > { %v1097_v2 = vadd.f32 %v1096_v21, %v2893_v1  ;;  %v1210_v23 = vadd.f32 %v1209_v22, %v2895_v3  ;;  %v1098_v24 = vpop.f32.mrb[30].mxu1  ;;  %v1211_v25 = vpop.f32.mrb[62].mxu0  ;;  %1719 = vmatprep.mubr.bf16.mxu1 %v1305_v15  ;;  %1816 = vmatprep.mubr.bf16.mxu0 %v1307_v16 }
 0x200   : > { %v1099_v26 = vadd.f32 %v1098_v24, %v2887_v63  ;;  %v1212_v27 = vadd.f32 %v1211_v25, %v2889_v0  ;;  %v1100_v28 = vpop.f32.mrb[31].mxu1  ;;  %v1213_v29 = vpop.f32.mrb[63].mxu0  ;;  %1720 = vmatmul.mubr.bf16.gmra.mrb[56].mxu1 %v1304_v13  ;;  %1817 = vmatmul.mubr.bf16.gmra.mrb[88].mxu0 %v1306_v14  ;;  %v1272_v34 = vmax.f32 %v1095_v19, 0.0  ;;  %v1274_v38 = vmax.f32 %v1208_v20, 0.0 }
 0x201   : > { %v1101_v30 = vadd.f32 %v1100_v28, %v2893_v1  ;;  %v1214_v31 = vadd.f32 %v1213_v29, %v2895_v3  ;;  %v1273_v41 = vmax.f32 %v1097_v2, 0.0  ;;  %v1275_v42 = vmax.f32 %v1210_v23, 0.0  ;;  %v2964_v3 = vld [vmem:[%s3020_s6] ss:$0 sm:$0xff] }
 0x202   : > { %v1276_v39 = vmax.f32 %v1099_v26, 0.0  ;;  %v1278_v40 = vmax.f32 %v1212_v27, 0.0 }
 0x203   : > { %v1277_v43 = vmax.f32 %v1101_v30, 0.0  ;;  %v1279_v44 = vmax.f32 %v1214_v31, 0.0 }
 0x204   : > { %v1308_v45 = vpack.c.bf16 %v1276_v39, %v1272_v34  ;;  %v1310_v63 = vpack.c.bf16 %v1278_v40, %v1274_v38 }
 0x205   : > { %v1309_v46 = vpack.c.bf16 %v1277_v43, %v1273_v41  ;;  %v1311_v0 = vpack.c.bf16 %v1279_v44, %v1275_v42 }
 0x207   : > { %1727 = vmatprep.mubr.bf16.mxu1 %v1309_v46  ;;  %1824 = vmatprep.mubr.bf16.mxu0 %v1311_v0 }
 0x208   : > { %1728 = vmatmul.mubr.bf16.gmra.mrb[60].mxu1 %v1308_v45  ;;  %1825 = vmatmul.mubr.bf16.gmra.mrb[92].mxu0 %v1310_v63 }
 0x2a3   : > { %v2105_v47 = vpop.f32.mrb[32].mxu1  ;;  %v2169_v1 = vpop.f32.mrb[64].mxu0 }
 0x2a4   : > { %v2106_v48 = vpop.f32.mrb[33].mxu1  ;;  %v2170_v49 = vpop.f32.mrb[65].mxu0 }
 0x2a5   : > { %v2107_v50 = vadd.f32 %v2106_v48, %v2105_v47  ;;  %v2171_v51 = vadd.f32 %v2170_v49, %v2169_v1  ;;  %v2108_v52 = vpop.f32.mrb[34].mxu1  ;;  %v2172_v53 = vpop.f32.mrb[66].mxu0 }
 0x2a6   : > { %v2109_v54 = vpop.f32.mrb[35].mxu1  ;;  %v2173_v55 = vpop.f32.mrb[67].mxu0 }
 0x2a7   : > { %v1674_v56 = vadd.f32 %v2107_v50, %v2964_v3  ;;  %v2110_v57 = vadd.f32 %v2109_v54, %v2108_v52  ;;  %v2174_v58 = vadd.f32 %v2173_v55, %v2172_v53 }
 0x2a9   : > { %v1771_v36 = vadd.f32 %v2171_v51, %v1674_v56  ;;  %v1677_v37 = vadd.f32 %v2110_v57, %v2964_v3 }
 0x2ab   : > { %2376 = vtanh.f32 %v1771_v36  ;;  %v1774_v59 = vadd.f32 %v2174_v58, %v1677_v37  ;;  %v2111_v60 = vpop.f32.mrb[36].mxu1  ;;  %v2175_v61 = vpop.f32.mrb[68].mxu0 }
 0x2ac   : > { %v2112_v62 = vpop.f32.mrb[37].mxu1  ;;  %v2176_v4 = vpop.f32.mrb[69].mxu0 }
 0x2ad   : > { %2378 = vtanh.f32 %v1774_v59  ;;  %v2113_v5 = vadd.f32 %v2112_v62, %v2111_v60  ;;  %v2177_v6 = vadd.f32 %v2176_v4, %v2175_v61  ;;  %v2114_v7 = vpop.f32.mrb[38].mxu1  ;;  %v2178_v8 = vpop.f32.mrb[70].mxu0 }
 0x2ae   : > { %v2115_v9 = vpop.f32.mrb[39].mxu1  ;;  %v2179_v10 = vpop.f32.mrb[71].mxu0 }
 0x2af   : > { %v1682_v33 = vadd.f32 %v2113_v5, %v2964_v3  ;;  %v2116_v11 = vadd.f32 %v2115_v9, %v2114_v7  ;;  %v2180_v12 = vadd.f32 %v2179_v10, %v2178_v8 }
 0x2b1   : > { %v1779_v32 = vadd.f32 %v2177_v6, %v1682_v33  ;;  %v1685_v35 = vadd.f32 %v2116_v11, %v2964_v3 }
 0x2b3   : > { %2380 = vtanh.f32 %v1779_v32  ;;  %v1782_v13 = vadd.f32 %v2180_v12, %v1685_v35  ;;  %v2117_v14 = vpop.f32.mrb[40].mxu1  ;;  %v2181_v15 = vpop.f32.mrb[72].mxu0 }
 0x2b4   : > { %v2118_v16 = vpop.f32.mrb[41].mxu1  ;;  %v2182_v17 = vpop.f32.mrb[73].mxu0 }
 0x2b5   : > { %v2377_v18 = vpop.eup %2376  ;;  %2382 = vtanh.f32 %v1782_v13  ;;  %v2119_v19 = vadd.f32 %v2118_v16, %v2117_v14  ;;  %v2183_v20 = vadd.f32 %v2182_v17, %v2181_v15  ;;  %v2120_v21 = vpop.f32.mrb[42].mxu1 }
 0x2b6   : > { %v2184_v22 = vpop.f32.mrb[74].mxu0  ;;  %1849 = vst [vmem:[%s2975_s29] sm:$0xff] %v2377_v18  ;;  %v2121_v2 = vpop.f32.mrb[43].mxu1 }
 0x2b7   : > { %v2185_v23 = vpop.f32.mrb[75].mxu0  ;;  %v2379_v24 = vpop.eup %2378  ;;  %v1690_v25 = vadd.f32 %v2119_v19, %v2964_v3  ;;  %v2122_v26 = vadd.f32 %v2121_v2, %v2120_v21 }
 0x2b8   : > { %v2186_v27 = vadd.f32 %v2185_v23, %v2184_v22  ;;  %1850 = vst [vmem:[%s2975_s29 + $0x8] sm:$0xff] %v2379_v24 }
 0x2b9   : > { %v1787_v28 = vadd.f32 %v2183_v20, %v1690_v25  ;;  %v1693_v29 = vadd.f32 %v2122_v26, %v2964_v3 }
 0x2bb   : > { %2384 = vtanh.f32 %v1787_v28  ;;  %v1790_v30 = vadd.f32 %v2186_v27, %v1693_v29  ;;  %v2123_v31 = vpop.f32.mrb[44].mxu1  ;;  %v2187_v34 = vpop.f32.mrb[76].mxu0 }
 0x2bc   : > { %v2124_v38 = vpop.f32.mrb[45].mxu1  ;;  %v2188_v39 = vpop.f32.mrb[77].mxu0 }
 0x2bd   : > { %v2381_v40 = vpop.eup %2380  ;;  %2386 = vtanh.f32 %v1790_v30  ;;  %v2125_v41 = vadd.f32 %v2124_v38, %v2123_v31  ;;  %v2189_v42 = vadd.f32 %v2188_v39, %v2187_v34  ;;  %v2126_v43 = vpop.f32.mrb[46].mxu1 }
 0x2be   : > { %v2190_v44 = vpop.f32.mrb[78].mxu0  ;;  %1851 = vst [vmem:[%s2975_s29 + $0x10] sm:$0xff] %v2381_v40  ;;  %v2127_v45 = vpop.f32.mrb[47].mxu1 }
 0x2bf   : > { %v2191_v63 = vpop.f32.mrb[79].mxu0  ;;  %v2383_v46 = vpop.eup %2382  ;;  %v1698_v0 = vadd.f32 %v2125_v41, %v2964_v3  ;;  %v2128_v47 = vadd.f32 %v2127_v45, %v2126_v43 }
 0x2c0   : > { %v2192_v1 = vadd.f32 %v2191_v63, %v2190_v44  ;;  %1852 = vst [vmem:[%s2975_s29 + $0x18] sm:$0xff] %v2383_v46 }
 0x2c1   : > { %v1795_v48 = vadd.f32 %v2189_v42, %v1698_v0  ;;  %v1701_v49 = vadd.f32 %v2128_v47, %v2964_v3 }
 0x2c3   : > { %2388 = vtanh.f32 %v1795_v48  ;;  %v1798_v50 = vadd.f32 %v2192_v1, %v1701_v49  ;;  %v2129_v51 = vpop.f32.mrb[48].mxu1  ;;  %v2193_v52 = vpop.f32.mrb[80].mxu0 }
 0x2c4   : > { %v2130_v53 = vpop.f32.mrb[49].mxu1  ;;  %v2194_v54 = vpop.f32.mrb[81].mxu0 }
 0x2c5   : > { %v2385_v55 = vpop.eup %2384  ;;  %2390 = vtanh.f32 %v1798_v50  ;;  %v2131_v56 = vadd.f32 %v2130_v53, %v2129_v51  ;;  %v2195_v57 = vadd.f32 %v2194_v54, %v2193_v52  ;;  %v2132_v58 = vpop.f32.mrb[50].mxu1 }
 0x2c6   : > { %v2196_v36 = vpop.f32.mrb[82].mxu0  ;;  %1853 = vst [vmem:[%s2975_s29 + $0x20] sm:$0xff] %v2385_v55  ;;  %v2133_v37 = vpop.f32.mrb[51].mxu1 }
 0x2c7   : > { %v2197_v59 = vpop.f32.mrb[83].mxu0  ;;  %v2387_v60 = vpop.eup %2386  ;;  %v1706_v61 = vadd.f32 %v2131_v56, %v2964_v3  ;;  %v2134_v62 = vadd.f32 %v2133_v37, %v2132_v58 }
 0x2c8   : > { %v2198_v4 = vadd.f32 %v2197_v59, %v2196_v36  ;;  %1854 = vst [vmem:[%s2975_s29 + $0x28] sm:$0xff] %v2387_v60 }
 0x2c9   : > { %v1803_v5 = vadd.f32 %v2195_v57, %v1706_v61  ;;  %v1709_v6 = vadd.f32 %v2134_v62, %v2964_v3 }
 0x2cb   : > { %2392 = vtanh.f32 %v1803_v5  ;;  %v1806_v7 = vadd.f32 %v2198_v4, %v1709_v6  ;;  %v2135_v8 = vpop.f32.mrb[52].mxu1  ;;  %v2199_v9 = vpop.f32.mrb[84].mxu0 }
 0x2cc   : > { %v2136_v10 = vpop.f32.mrb[53].mxu1  ;;  %v2200_v33 = vpop.f32.mrb[85].mxu0 }
 0x2cd   : > { %v2389_v11 = vpop.eup %2388  ;;  %2394 = vtanh.f32 %v1806_v7  ;;  %v2137_v12 = vadd.f32 %v2136_v10, %v2135_v8  ;;  %v2201_v32 = vadd.f32 %v2200_v33, %v2199_v9  ;;  %v2138_v35 = vpop.f32.mrb[54].mxu1 }
 0x2ce   : > { %v2202_v13 = vpop.f32.mrb[86].mxu0  ;;  %1855 = vst [vmem:[%s2975_s29 + $0x30] sm:$0xff] %v2389_v11  ;;  %v2139_v14 = vpop.f32.mrb[55].mxu1 }
 0x2cf   : > { %v2203_v15 = vpop.f32.mrb[87].mxu0  ;;  %v2391_v16 = vpop.eup %2390  ;;  %v1714_v17 = vadd.f32 %v2137_v12, %v2964_v3  ;;  %v2140_v18 = vadd.f32 %v2139_v14, %v2138_v35 }
 0x2d0   : > { %v2204_v19 = vadd.f32 %v2203_v15, %v2202_v13  ;;  %1856 = vst [vmem:[%s2975_s29 + $0x38] sm:$0xff] %v2391_v16 }
 0x2d1   : > { %v1811_v20 = vadd.f32 %v2201_v32, %v1714_v17  ;;  %v1717_v21 = vadd.f32 %v2140_v18, %v2964_v3 }
 0x2d3   : > { %2396 = vtanh.f32 %v1811_v20  ;;  %v1814_v22 = vadd.f32 %v2204_v19, %v1717_v21  ;;  %v2141_v2 = vpop.f32.mrb[56].mxu1  ;;  %v2205_v23 = vpop.f32.mrb[88].mxu0 }
 0x2d4   : > { %v2142_v24 = vpop.f32.mrb[57].mxu1  ;;  %v2206_v25 = vpop.f32.mrb[89].mxu0 }
 0x2d5   : > { %v2393_v26 = vpop.eup %2392  ;;  %2398 = vtanh.f32 %v1814_v22  ;;  %v2143_v27 = vadd.f32 %v2142_v24, %v2141_v2  ;;  %v2207_v28 = vadd.f32 %v2206_v25, %v2205_v23  ;;  %v2144_v29 = vpop.f32.mrb[58].mxu1 }
 0x2d6   : > { %v2208_v30 = vpop.f32.mrb[90].mxu0  ;;  %1857 = vst [vmem:[%s2975_s29 + $0x40] sm:$0xff] %v2393_v26  ;;  %v2145_v31 = vpop.f32.mrb[59].mxu1 }
 0x2d7   : > { %v2209_v34 = vpop.f32.mrb[91].mxu0  ;;  %v2395_v38 = vpop.eup %2394  ;;  %v1722_v39 = vadd.f32 %v2143_v27, %v2964_v3  ;;  %v2146_v40 = vadd.f32 %v2145_v31, %v2144_v29 }
 0x2d8   : > { %v2210_v41 = vadd.f32 %v2209_v34, %v2208_v30  ;;  %1858 = vst [vmem:[%s2975_s29 + $0x48] sm:$0xff] %v2395_v38 }
 0x2d9   : > { %v1819_v42 = vadd.f32 %v2207_v28, %v1722_v39  ;;  %v1725_v43 = vadd.f32 %v2146_v40, %v2964_v3 }
 0x2db   : > { %2400 = vtanh.f32 %v1819_v42  ;;  %v1822_v44 = vadd.f32 %v2210_v41, %v1725_v43  ;;  %v2147_v45 = vpop.f32.mrb[60].mxu1  ;;  %v2211_v63 = vpop.f32.mrb[92].mxu0 }
 0x2dc   : > { %v2148_v46 = vpop.f32.mrb[61].mxu1  ;;  %v2212_v0 = vpop.f32.mrb[93].mxu0 }
 0x2dd   : > { %v2397_v47 = vpop.eup %2396  ;;  %2402 = vtanh.f32 %v1822_v44  ;;  %v2149_v1 = vadd.f32 %v2148_v46, %v2147_v45  ;;  %v2213_v48 = vadd.f32 %v2212_v0, %v2211_v63  ;;  %v2150_v49 = vpop.f32.mrb[62].mxu1 }
 0x2de   : > { %v2214_v50 = vpop.f32.mrb[94].mxu0  ;;  %1859 = vst [vmem:[%s2975_s29 + $0x50] sm:$0xff] %v2397_v47  ;;  %v2151_v51 = vpop.f32.mrb[63].mxu1 }
 0x2df   : > { %v2215_v52 = vpop.f32.mrb[95].mxu0  ;;  %v2399_v53 = vpop.eup %2398  ;;  %v1730_v54 = vadd.f32 %v2149_v1, %v2964_v3  ;;  %v2152_v55 = vadd.f32 %v2151_v51, %v2150_v49 }
 0x2e0   : > { %v2216_v56 = vadd.f32 %v2215_v52, %v2214_v50  ;;  %1860 = vst [vmem:[%s2975_s29 + $0x58] sm:$0xff] %v2399_v53 }
 0x2e1   : > { %v1827_v57 = vadd.f32 %v2213_v48, %v1730_v54  ;;  %v1733_v58 = vadd.f32 %v2152_v55, %v2964_v3 }
 0x2e3   : > { %2404 = vtanh.f32 %v1827_v57  ;;  %v1830_v36 = vadd.f32 %v2216_v56, %v1733_v58 }
 0x2e5   : > { %v2401_v37 = vpop.eup %2400  ;;  %2406 = vtanh.f32 %v1830_v36 }
 0x2e6   : > { %1861 = vst [vmem:[%s2975_s29 + $0x60] sm:$0xff] %v2401_v37 }
 0x2e7   : > { %v2403_v59 = vpop.eup %2402 }
 0x2e8   : > { %1862 = vst [vmem:[%s2975_s29 + $0x68] sm:$0xff] %v2403_v59 }
 0x2ed   : > { %v2405_v60 = vpop.eup %2404 }
 0x2ee   : > { %1863 = vst [vmem:[%s2975_s29 + $0x70] sm:$0xff] %v2405_v60 }
 0x2ef   : > { %v2407_v61 = vpop.eup %2406 }
 0x2f0   : > { %1864 = vst [vmem:[%s2975_s29 + $0x78] sm:$0xff] %v2407_v61 }
 0x2f1 PF: > { %s17_s26 = sadd.s32 1, %s2430_s26   ;;  %s3022_s24 = smov %s2426_s25 }
 0x2f2   : > { %p14_p5 = scmp.ge.s32.totalorder %s17_s26, 4   ;;  %s3023_s25 = smov %s3025_s27 }
 0x2f4   :  { %16 = sbr.rel (!%p14_p5) target bundleno = 2 (0x2), region = 88 }

</bundles_post_ra>
